<compile_context>
chip_gen: v7x
topology: tpu7x:2x2x1
jax: 0.10.0
libtpu: 0.0.40
codegen_flags: <defaults>
</compile_context>

<pallas_src>
import numpy as np
import jax
import jax.numpy as jnp
from jax.experimental import pallas as pl
from jax.experimental.pallas import tpu as pltpu

# ---- scaled-down model dims -------------------------------------------------
SEQ = 8                      # query length
PAST = 8                     # cached kv length
KV = SEQ + PAST              # total kv length
HEADS = 2
HEAD_DIM = 128
GROUPS = 1                   # multi-query groups (head batching below relies on GROUPS=1)
HIDDEN = HEADS * HEAD_DIM    # 256
KV_DIM = GROUPS * HEAD_DIM   # 128
QKV_DIM = HIDDEN + 2 * KV_DIM          # fused qkv output width (512)
SW_DIM = HIDDEN + KV_DIM               # pair-swapped q+k columns (384)
QKV_AUG = QKV_DIM + SW_DIM             # augmented qkv projection width (896)
FFN = 512
ROT = 64                     # rotary dims per head (2 * 32 thetas)
EPS = 1e-5


def _rmsnorm(x, w):
    var = jnp.mean(x * x, axis=-1, keepdims=True)
    return x * jax.lax.rsqrt(var + EPS) * w


def glm2_block_kernel(
    x_ref, maskb_ref, cos_k_ref, sin_k_ref, cos_q_ref, sin_q_ref,
    past_k_ref, past_v_ref,
    w_qkv_ref, b_qkv_ref, w_dense_ref, ln1_ref, ln2_ref,
    w_h4_ref, w_4h_ref, lnf_ref,
    out_final_ref, out_k_ref, out_v_ref,
):
    x = x_ref[...]                                                   # [SEQ, HIDDEN] f32

    # ---- input RMSNorm + one fused (augmented) QKV projection on the MXU ----
    # columns: [ q(256) | k(128) | v(128) | pairswap(q)(256) | pairswap(k)(128) ]
    xn = _rmsnorm(x, ln1_ref[...]).astype(jnp.bfloat16)
    qkv = jnp.dot(xn, w_qkv_ref[...],
                  preferred_element_type=jnp.float32) + b_qkv_ref[...]

    k = qkv[:, HIDDEN:HIDDEN + KV_DIM]                               # [SEQ, KV_DIM]
    v = qkv[:, HIDDEN + KV_DIM:QKV_DIM]                              # [SEQ, KV_DIM]
    k_sw = qkv[:, QKV_DIM + HIDDEN:]                                 # pairswap(k)

    # ---- rotary on k (all rows, needed for presents): k*cos + swap(k)*sin ----
    k_rot = k * cos_k_ref[...] + k_sw * sin_k_ref[...]               # [SEQ, KV_DIM]

    # ---- full K/V built in vregs (outputs are stored at the end of the kernel) ----
    # TODO(synk): at realistic decode KV lengths, alias a persistent cache buffer via
    # input_output_aliases (memory_space=pl.ANY) and DMA only the new SEQ rows instead
    # of round-tripping the whole cache; at PAST=8 the full copy is noise.
    k_full = jnp.concatenate([past_k_ref[...], k_rot], axis=0)       # [KV, KV_DIM]
    v_full = jnp.concatenate([past_v_ref[...], v], axis=0)           # [KV, KV_DIM]

    # ---- rotary for the last query row (all the block returns) ----
    # cos_q/sin_q are [1, HIDDEN] tables, tiled per head and pre-scaled by 1/sqrt(HD).
    q_last = qkv[SEQ - 1:SEQ, 0:HIDDEN]                              # [1, HIDDEN]
    q_sw_last = qkv[SEQ - 1:SEQ, QKV_DIM:QKV_DIM + HIDDEN]
    q_rot = q_last * cos_q_ref[...] + q_sw_last * sin_q_ref[...]     # [1, HIDDEN], scaled

    # ---- batched attention: both heads share k_full/v_full (GROUPS == 1) ----
    q_heads = jnp.concatenate(
        [q_rot[:, h * HEAD_DIM:(h + 1) * HEAD_DIM] for h in range(HEADS)],
        axis=0)                                                      # [HEADS, HEAD_DIM]
    scores = jax.lax.dot_general(
        q_heads.astype(jnp.bfloat16), k_full.astype(jnp.bfloat16),
        (((1,), (1,)), ((), ())),
        preferred_element_type=jnp.float32)                          # [HEADS, KV]
    scores = scores + maskb_ref[...]                                 # additive mask bias

    m = jnp.max(scores, axis=-1, keepdims=True)
    e = jnp.exp(scores - m)
    p = e * pl.reciprocal(jnp.sum(e, axis=-1, keepdims=True), approx=True)
    ctx = jnp.dot(p.astype(jnp.bfloat16), v_full.astype(jnp.bfloat16),
                  preferred_element_type=jnp.float32)                # [HEADS, HEAD_DIM]
    ctx_flat = jnp.concatenate([ctx[h:h + 1, :] for h in range(HEADS)],
                               axis=-1)                              # [1, HIDDEN]

    # ---- attention output projection + residual (last row only) ----
    attn_out = jnp.dot(ctx_flat.astype(jnp.bfloat16), w_dense_ref[...],
                       preferred_element_type=jnp.float32)
    h1 = x[SEQ - 1:SEQ, :] + attn_out                                # [1, HIDDEN]

    # ---- post-attention RMSNorm + SwiGLU MLP + residual ----
    hn = _rmsnorm(h1, ln2_ref[...]).astype(jnp.bfloat16)
    up = jnp.dot(hn, w_h4_ref[...], preferred_element_type=jnp.float32)  # [1, 2*FFN]
    u_a = up[:, :FFN]
    u_b = up[:, FFN:]
    gated = (u_a * jax.nn.sigmoid(u_a)) * u_b                        # SiLU(a) * b
    mlp_out = jnp.dot(gated.astype(jnp.bfloat16), w_4h_ref[...],
                      preferred_element_type=jnp.float32)
    y = h1 + mlp_out                                                 # [1, HIDDEN]

    # ---- final RMSNorm (GLM2Block final_layernorm + last-token selection) ----
    out_final_ref[...] = _rmsnorm(y, lnf_ref[...])

    # ---- presents written last so the stores overlap with the dense/MLP epilogue ----
    out_k_ref[...] = k_full
    out_v_ref[...] = v_full


def prepare_params(params):
    """One-time weight prep: fold the rotary pair-swap permutation into extra qkv
    weight columns and cast the big weights to bf16 (weights stream as bf16; bias and
    layernorm weights stay f32)."""
    swap = np.arange(HEAD_DIM)
    swap[0:ROT:2] = np.arange(1, ROT, 2)
    swap[1:ROT:2] = np.arange(0, ROT, 2)
    perm = np.concatenate([blk * HEAD_DIM + swap for blk in range(HEADS + GROUPS)])

    w_qkv = np.asarray(params["w_qkv"], np.float32)
    b_qkv = np.asarray(params["b_qkv"], np.float32)
    w_aug = np.concatenate([w_qkv, w_qkv[:, :SW_DIM][:, perm]], axis=1)   # [HIDDEN, 896]
    b_aug = np.concatenate([b_qkv, b_qkv[:, :SW_DIM][:, perm]], axis=1)   # [1, 896]

    # TODO(synk): on v7x at real dims, gate these casts to fp8 (scales folded into the
    # f32 bias / epilogue) to halve weight bytes and double MXU rate.
    return {
        "w_qkv_aug": jnp.asarray(w_aug, jnp.bfloat16),
        "b_qkv_aug": jnp.asarray(b_aug, jnp.float32),
        "w_dense": params["w_dense"].astype(jnp.bfloat16),
        "w_h4": params["w_h4"].astype(jnp.bfloat16),
        "w_4h": params["w_4h"].astype(jnp.bfloat16),
        "ln1_w": params["ln1_w"],
        "ln2_w": params["ln2_w"],
        "lnf_w": params["lnf_w"],
    }


def glm2_block_forward(hidden_states, attention_mask, position_ids, past_kv, prepared):
    # TODO(synk): for un-shrunk dims (hidden=4096) the whole-array VMEM specs must
    # become a grid over weight-column tiles with dimension_semantics=("parallel",
    # "arbitrary") and an explicit vmem_limit_bytes (mandatory on v7x's 64 MiB VMEM,
    # larger tiles on v6e's 128 MiB); at toy dims a single shot is best.
    x = hidden_states[:, 0, :].astype(jnp.float32)                   # [SEQ, HIDDEN]

    # rotary tables, exactly as GLM2Block.forward builds rotary_pos_emb, expressed as
    # two compact per-head-dim tables: cos (pair-repeated, 1-padded) and sign-folded
    # sin ([-s,+s,...], 0-padded).  [SEQ, HEAD_DIM] each (used for k); the last-row q
    # tables are tiled across heads and pre-scaled by 1/sqrt(HEAD_DIM) here (jitted).
    theta = 1.0 / (10000.0 ** (jnp.arange(0, 64, 2, dtype=jnp.float32) / 64.0))  # [32]
    idx_theta = position_ids.astype(jnp.float32).reshape(-1, 1) * theta          # [SEQ, 32]
    cos, sin = jnp.cos(idx_theta), jnp.sin(idx_theta)
    cos_hd = jnp.concatenate(
        [jnp.repeat(cos, 2, axis=-1), jnp.ones((SEQ, HEAD_DIM - ROT), jnp.float32)],
        axis=-1)
    sin_hd = jnp.concatenate(
        [jnp.stack([-sin, sin], axis=-1).reshape(SEQ, ROT),
         jnp.zeros((SEQ, HEAD_DIM - ROT), jnp.float32)],
        axis=-1)

    scale = jnp.float32(1.0 / np.sqrt(HEAD_DIM))
    cos_q = jnp.tile(cos_hd[SEQ - 1:SEQ, :] * scale, (1, HEADS))     # [1, HIDDEN]
    sin_q = jnp.tile(sin_hd[SEQ - 1:SEQ, :] * scale, (1, HEADS))     # [1, HIDDEN]

    # only the last query row's attention is ever returned -> only its mask row is
    # needed, passed as an additive bias (0 unmasked / -1e30 masked).
    mask_last = attention_mask[0, 0, SEQ - 1:SEQ, :]
    mask_bias = jnp.where(mask_last, jnp.float32(-1e30), jnp.float32(0.0))  # [1, KV]

    past_k = past_kv[0, :, 0].reshape(PAST, KV_DIM).astype(jnp.float32)
    past_v = past_kv[1, :, 0].reshape(PAST, KV_DIM).astype(jnp.float32)

    vm = pl.BlockSpec(memory_space=pltpu.MemorySpace.VMEM)
    inputs = (x, mask_bias, cos_hd, sin_hd, cos_q, sin_q, past_k, past_v,
              prepared["w_qkv_aug"], prepared["b_qkv_aug"], prepared["w_dense"],
              prepared["ln1_w"], prepared["ln2_w"], prepared["w_h4"],
              prepared["w_4h"], prepared["lnf_w"])

    out_final, k_cache, v_cache = pl.pallas_call(
        glm2_block_kernel,
        out_shape=(
            jax.ShapeDtypeStruct((1, HIDDEN), jnp.float32),
            jax.ShapeDtypeStruct((KV, KV_DIM), jnp.float32),
            jax.ShapeDtypeStruct((KV, KV_DIM), jnp.float32),
        ),
        in_specs=[vm] * len(inputs),
        out_specs=(vm, vm, vm),
    )(*inputs)

    hidden_out = out_final.reshape(1, 1, HIDDEN)                     # last token, final-norm'ed
    presents = jnp.stack([
        k_cache.reshape(KV, 1, GROUPS, HEAD_DIM),
        v_cache.reshape(KV, 1, GROUPS, HEAD_DIM),
    ])                                                               # [2, KV, 1, G, HD]
    return hidden_out, presents


# ---- pure-JAX reference (f32, no Pallas) for a correctness cross-check ----
def reference_forward(hidden_states, attention_mask, position_ids, past_kv, params):
    x = hidden_states[:, 0, :].astype(jnp.float32)
    sq = x.shape[0]

    def rms(v, w):
        return v * jax.lax.rsqrt(jnp.mean(v * v, -1, keepdims=True) + EPS) * w

    theta = 1.0 / (10000.0 ** (jnp.arange(0, 64, 2, dtype=jnp.float32) / 64.0))
    idx = position_ids.astype(jnp.float32)[:, None] * theta
    cos, sin = jnp.cos(idx), jnp.sin(idx)

    xn = rms(x, params["ln1_w"])
    qkv = xn @ params["w_qkv"] + params["b_qkv"]
    q = qkv[:, :HIDDEN].reshape(sq, HEADS, HEAD_DIM)
    k = qkv[:, HIDDEN:HIDDEN + KV_DIM].reshape(sq, GROUPS, HEAD_DIM)
    v = qkv[:, HIDDEN + KV_DIM:QKV_DIM].reshape(sq, GROUPS, HEAD_DIM)

    def rope(t):  # interleaved-pair rotary on the first ROT dims, as in ChatGLM2
        tr = t[..., :ROT].reshape(sq, t.shape[1], ROT // 2, 2)
        c = cos[:, None, :]
        s = sin[:, None, :]
        o0 = tr[..., 0] * c - tr[..., 1] * s
        o1 = tr[..., 1] * c + tr[..., 0] * s
        out = jnp.stack([o0, o1], -1).reshape(sq, t.shape[1], ROT)
        return jnp.concatenate([out, t[..., ROT:]], -1)

    q = rope(q)
    k = rope(k)
    k_full = jnp.concatenate([past_kv[0, :, 0], k], axis=0)          # [KV, G, HD]
    v_full = jnp.concatenate([past_kv[1, :, 0], v], axis=0)
    ke = jnp.repeat(k_full, HEADS // GROUPS, axis=1)                 # [KV, HEADS, HD]
    ve = jnp.repeat(v_full, HEADS // GROUPS, axis=1)
    scores = jnp.einsum("shd,khd->hsk", q, ke) / np.sqrt(HEAD_DIM)
    mask = attention_mask[0, 0]                                      # bool [SEQ, KV]
    scores = jnp.where(mask[None], -jnp.inf, scores)
    probs = jax.nn.softmax(scores, axis=-1)
    ctx = jnp.einsum("hsk,khd->shd", probs, ve).reshape(sq, HIDDEN)
    h1 = x + ctx @ params["w_dense"]
    hn = rms(h1, params["ln2_w"])
    up = hn @ params["w_h4"]
    gated = jax.nn.silu(up[:, :FFN]) * up[:, FFN:]
    y = h1 + gated @ params["w_4h"]
    yf = rms(y, params["lnf_w"])[-1:].reshape(1, 1, HIDDEN)
    presents = jnp.stack([k_full[:, None], v_full[:, None]])
    return yf, presents


def init_params(key):
    ks = jax.random.split(key, 8)
    s = 0.02
    return {
        "w_qkv": jax.random.normal(ks[0], (HIDDEN, QKV_DIM), jnp.float32) * s,
        "b_qkv": jax.random.normal(ks[1], (1, QKV_DIM), jnp.float32) * s,
        "w_dense": jax.random.normal(ks[2], (HIDDEN, HIDDEN), jnp.float32) * s,
        "w_h4": jax.random.normal(ks[3], (HIDDEN, 2 * FFN), jnp.float32) * s,
        "w_4h": jax.random.normal(ks[4], (FFN, HIDDEN), jnp.float32) * s,
        "ln1_w": 1.0 + 0.1 * jax.random.normal(ks[5], (1, HIDDEN), jnp.float32),
        "ln2_w": 1.0 + 0.1 * jax.random.normal(ks[6], (1, HIDDEN), jnp.float32),
        "lnf_w": 1.0 + 0.1 * jax.random.normal(ks[7], (1, HIDDEN), jnp.float32),
    }


if __name__ == "__main__":
    key = jax.random.PRNGKey(0)
    kp, kx, kk, kv = jax.random.split(key, 4)
    params = init_params(kp)
    prepared = prepare_params(params)          # one-time: bf16 weights + folded rotary perm

    hidden_states = jax.random.normal(kx, (SEQ, 1, HIDDEN), jnp.float32)
    position_ids = PAST + jnp.arange(SEQ, dtype=jnp.int32)
    q_pos = PAST + jnp.arange(SEQ)[:, None]
    k_pos = jnp.arange(KV)[None, :]
    attention_mask = (k_pos > q_pos).reshape(1, 1, SEQ, KV)          # True == masked (ChatGLM2)
    past_kv = jnp.stack([
        jax.random.normal(kk, (PAST, 1, GROUPS, HEAD_DIM), jnp.float32),
        jax.random.normal(kv, (PAST, 1, GROUPS, HEAD_DIM), jnp.float32),
    ])                                                               # [2, PAST, 1, G, HD]

    fwd = jax.jit(glm2_block_forward)
    out_hidden, presents = fwd(hidden_states, attention_mask, position_ids,
                               past_kv, prepared)
    jax.block_until_ready((out_hidden, presents))

    ref_hidden, ref_presents = reference_forward(
        hidden_states, attention_mask, position_ids, past_kv, params)

    assert out_hidden.shape == (1, 1, HIDDEN)
    assert presents.shape == (2, KV, 1, GROUPS, HEAD_DIM)
    # bf16 weights / attention operands inside the kernel vs f32 reference -> modest tolerance
    np.testing.assert_allclose(np.asarray(out_hidden), np.asarray(ref_hidden),
                               rtol=2e-2, atol=2e-2)
    np.testing.assert_allclose(np.asarray(presents), np.asarray(ref_presents),
                               rtol=2e-2, atol=2e-2)
    print("KERNEL_OK")
</pallas_src>

<mosaic_0001>
module attributes {stable_mosaic.version = 11 : i64} {
  func.func @glm2_block_kernel(%arg0: memref<8x256xf32, #tpu.memory_space<vmem>>, %arg1: memref<1x16xf32, #tpu.memory_space<vmem>>, %arg2: memref<8x128xf32, #tpu.memory_space<vmem>>, %arg3: memref<8x128xf32, #tpu.memory_space<vmem>>, %arg4: memref<1x256xf32, #tpu.memory_space<vmem>>, %arg5: memref<1x256xf32, #tpu.memory_space<vmem>>, %arg6: memref<8x128xf32, #tpu.memory_space<vmem>>, %arg7: memref<8x128xf32, #tpu.memory_space<vmem>>, %arg8: memref<256x896xbf16, #tpu.memory_space<vmem>>, %arg9: memref<1x896xf32, #tpu.memory_space<vmem>>, %arg10: memref<256x256xbf16, #tpu.memory_space<vmem>>, %arg11: memref<1x256xf32, #tpu.memory_space<vmem>>, %arg12: memref<1x256xf32, #tpu.memory_space<vmem>>, %arg13: memref<256x1024xbf16, #tpu.memory_space<vmem>>, %arg14: memref<512x256xbf16, #tpu.memory_space<vmem>>, %arg15: memref<1x256xf32, #tpu.memory_space<vmem>>, %arg16: memref<1x256xf32, #tpu.memory_space<vmem>>, %arg17: memref<16x128xf32, #tpu.memory_space<vmem>>, %arg18: memref<16x128xf32, #tpu.memory_space<vmem>>) attributes {dimension_semantics = [], scalar_prefetch = 0 : i64, scratch_operands = 0 : i64, tpu.core_type = #tpu.core_type<tc>} {
    %c0 = arith.constant 0 : index
    %c0_0 = arith.constant 0 : index
    %0 = vector.load %arg0[%c0, %c0_0] : memref<8x256xf32, #tpu.memory_space<vmem>>, vector<8x256xf32>
    %c0_1 = arith.constant 0 : index
    %c0_2 = arith.constant 0 : index
    %1 = vector.load %arg11[%c0_1, %c0_2] : memref<1x256xf32, #tpu.memory_space<vmem>>, vector<1x256xf32>
    %2 = arith.mulf %0, %0 : vector<8x256xf32>
    %cst = arith.constant dense<0.000000e+00> : vector<8xf32>
    %3 = vector.multi_reduction <add>, %2, %cst [1] : vector<8x256xf32> to vector<8xf32>
    %4 = vector.shape_cast %3 : vector<8xf32> to vector<8x1xf32>
    %cst_3 = arith.constant 2.560000e+02 : f32
    %5 = vector.broadcast %cst_3 : f32 to vector<8x1xf32>
    %6 = arith.divf %4, %5 : vector<8x1xf32>
    %cst_4 = arith.constant 9.99999974E-6 : f32
    %7 = vector.broadcast %cst_4 : f32 to vector<8x1xf32>
    %8 = arith.addf %6, %7 : vector<8x1xf32>
    %9 = math.rsqrt %8 : vector<8x1xf32>
    %10 = vector.broadcast %9 : vector<8x1xf32> to vector<8x256xf32>
    %11 = arith.mulf %0, %10 : vector<8x256xf32>
    %12 = vector.broadcast %1 : vector<1x256xf32> to vector<8x256xf32>
    %13 = arith.mulf %11, %12 : vector<8x256xf32>
    %14 = arith.truncf %13 : vector<8x256xf32> to vector<8x256xbf16>
    %c0_5 = arith.constant 0 : index
    %c0_6 = arith.constant 0 : index
    %15 = vector.load %arg8[%c0_5, %c0_6] : memref<256x896xbf16, #tpu.memory_space<vmem>>, vector<256x896xbf16>
    %cst_7 = arith.constant dense<0.000000e+00> : vector<8x896xf32>
    %16 = tpu.matmul %14, %15, %cst_7 {dimension_numbers = #tpu.dot_dimension_numbers<[1], [0], [0], [1], [0, 0, 1, 1], [], []>} : vector<8x256xbf16>, vector<256x896xbf16>, vector<8x896xf32> -> vector<8x896xf32>
    %c0_8 = arith.constant 0 : index
    %c0_9 = arith.constant 0 : index
    %17 = vector.load %arg9[%c0_8, %c0_9] : memref<1x896xf32, #tpu.memory_space<vmem>>, vector<1x896xf32>
    %18 = vector.broadcast %17 : vector<1x896xf32> to vector<8x896xf32>
    %19 = arith.addf %16, %18 : vector<8x896xf32>
    %20 = vector.extract_strided_slice %19 {offsets = [0, 256], sizes = [8, 128], strides = [1, 1]} : vector<8x896xf32> to vector<8x128xf32>
    %21 = vector.extract_strided_slice %19 {offsets = [0, 384], sizes = [8, 128], strides = [1, 1]} : vector<8x896xf32> to vector<8x128xf32>
    %22 = vector.extract_strided_slice %19 {offsets = [0, 768], sizes = [8, 128], strides = [1, 1]} : vector<8x896xf32> to vector<8x128xf32>
    %c0_10 = arith.constant 0 : index
    %c0_11 = arith.constant 0 : index
    %23 = vector.load %arg2[%c0_10, %c0_11] : memref<8x128xf32, #tpu.memory_space<vmem>>, vector<8x128xf32>
    %24 = arith.mulf %20, %23 : vector<8x128xf32>
    %c0_12 = arith.constant 0 : index
    %c0_13 = arith.constant 0 : index
    %25 = vector.load %arg3[%c0_12, %c0_13] : memref<8x128xf32, #tpu.memory_space<vmem>>, vector<8x128xf32>
    %26 = arith.mulf %22, %25 : vector<8x128xf32>
    %27 = arith.addf %24, %26 : vector<8x128xf32>
    %c0_14 = arith.constant 0 : index
    %c0_15 = arith.constant 0 : index
    %28 = vector.load %arg6[%c0_14, %c0_15] : memref<8x128xf32, #tpu.memory_space<vmem>>, vector<8x128xf32>
    %29 = tpu.concatenate %28, %27 in 0 : vector<8x128xf32>, vector<8x128xf32> -> vector<16x128xf32>
    %c0_16 = arith.constant 0 : index
    %c0_17 = arith.constant 0 : index
    %30 = vector.load %arg7[%c0_16, %c0_17] : memref<8x128xf32, #tpu.memory_space<vmem>>, vector<8x128xf32>
    %31 = tpu.concatenate %30, %21 in 0 : vector<8x128xf32>, vector<8x128xf32> -> vector<16x128xf32>
    %32 = vector.extract_strided_slice %19 {offsets = [7, 0], sizes = [1, 256], strides = [1, 1]} : vector<8x896xf32> to vector<1x256xf32>
    %33 = vector.extract_strided_slice %19 {offsets = [7, 512], sizes = [1, 256], strides = [1, 1]} : vector<8x896xf32> to vector<1x256xf32>
    %c0_18 = arith.constant 0 : index
    %c0_19 = arith.constant 0 : index
    %34 = vector.load %arg4[%c0_18, %c0_19] : memref<1x256xf32, #tpu.memory_space<vmem>>, vector<1x256xf32>
    %35 = arith.mulf %32, %34 : vector<1x256xf32>
    %c0_20 = arith.constant 0 : index
    %c0_21 = arith.constant 0 : index
    %36 = vector.load %arg5[%c0_20, %c0_21] : memref<1x256xf32, #tpu.memory_space<vmem>>, vector<1x256xf32>
    %37 = arith.mulf %33, %36 : vector<1x256xf32>
    %38 = arith.addf %35, %37 : vector<1x256xf32>
    %39 = vector.extract_strided_slice %38 {offsets = [0, 0], sizes = [1, 128], strides = [1, 1]} : vector<1x256xf32> to vector<1x128xf32>
    %40 = vector.extract_strided_slice %38 {offsets = [0, 128], sizes = [1, 128], strides = [1, 1]} : vector<1x256xf32> to vector<1x128xf32>
    %41 = tpu.concatenate %39, %40 in 0 : vector<1x128xf32>, vector<1x128xf32> -> vector<2x128xf32>
    %42 = arith.truncf %41 : vector<2x128xf32> to vector<2x128xbf16>
    %43 = arith.truncf %29 : vector<16x128xf32> to vector<16x128xbf16>
    %cst_22 = arith.constant dense<0.000000e+00> : vector<2x16xf32>
    %44 = tpu.matmul %42, %43, %cst_22 {dimension_numbers = #tpu.dot_dimension_numbers<[1], [1], [0], [0], [0, 0, 1, 0], [], []>} : vector<2x128xbf16>, vector<16x128xbf16>, vector<2x16xf32> -> vector<2x16xf32>
    %c0_23 = arith.constant 0 : index
    %c0_24 = arith.constant 0 : index
    %45 = vector.load %arg1[%c0_23, %c0_24] : memref<1x16xf32, #tpu.memory_space<vmem>>, vector<1x16xf32>
    %46 = vector.broadcast %45 : vector<1x16xf32> to vector<2x16xf32>
    %47 = arith.addf %44, %46 : vector<2x16xf32>
    %cst_25 = arith.constant dense<0xFF800000> : vector<2xf32>
    %48 = vector.multi_reduction <maximumf>, %47, %cst_25 [1] : vector<2x16xf32> to vector<2xf32>
    %49 = vector.shape_cast %48 : vector<2xf32> to vector<2x1xf32>
    %50 = vector.broadcast %49 : vector<2x1xf32> to vector<2x16xf32>
    %51 = arith.subf %47, %50 : vector<2x16xf32>
    %52 = math.exp %51 : vector<2x16xf32>
    %cst_26 = arith.constant dense<0.000000e+00> : vector<2xf32>
    %53 = vector.multi_reduction <add>, %52, %cst_26 [1] : vector<2x16xf32> to vector<2xf32>
    %54 = vector.shape_cast %53 : vector<2xf32> to vector<2x1xf32>
    %55 = tpu.reciprocal %54 {approx = true} : vector<2x1xf32> -> vector<2x1xf32>
    %56 = vector.broadcast %55 : vector<2x1xf32> to vector<2x16xf32>
    %57 = arith.mulf %52, %56 : vector<2x16xf32>
    %58 = arith.truncf %57 : vector<2x16xf32> to vector<2x16xbf16>
    %59 = arith.truncf %31 : vector<16x128xf32> to vector<16x128xbf16>
    %cst_27 = arith.constant dense<0.000000e+00> : vector<2x128xf32>
    %60 = tpu.matmul %58, %59, %cst_27 {dimension_numbers = #tpu.dot_dimension_numbers<[1], [0], [0], [1], [0, 0, 1, 1], [], []>} : vector<2x16xbf16>, vector<16x128xbf16>, vector<2x128xf32> -> vector<2x128xf32>
    %61 = vector.extract_strided_slice %60 {offsets = [0, 0], sizes = [1, 128], strides = [1, 1]} : vector<2x128xf32> to vector<1x128xf32>
    %62 = vector.extract_strided_slice %60 {offsets = [1, 0], sizes = [1, 128], strides = [1, 1]} : vector<2x128xf32> to vector<1x128xf32>
    %63 = tpu.concatenate %61, %62 in 1 : vector<1x128xf32>, vector<1x128xf32> -> vector<1x256xf32>
    %64 = arith.truncf %63 : vector<1x256xf32> to vector<1x256xbf16>
    %c0_28 = arith.constant 0 : index
    %c0_29 = arith.constant 0 : index
    %65 = vector.load %arg10[%c0_28, %c0_29] : memref<256x256xbf16, #tpu.memory_space<vmem>>, vector<256x256xbf16>
    %cst_30 = arith.constant dense<0.000000e+00> : vector<1x256xf32>
    %66 = tpu.matmul %64, %65, %cst_30 {dimension_numbers = #tpu.dot_dimension_numbers<[1], [0], [0], [1], [0, 0, 1, 1], [], []>} : vector<1x256xbf16>, vector<256x256xbf16>, vector<1x256xf32> -> vector<1x256xf32>
    %67 = vector.extract_strided_slice %0 {offsets = [7, 0], sizes = [1, 256], strides = [1, 1]} : vector<8x256xf32> to vector<1x256xf32>
    %68 = arith.addf %67, %66 : vector<1x256xf32>
    %c0_31 = arith.constant 0 : index
    %c0_32 = arith.constant 0 : index
    %69 = vector.load %arg12[%c0_31, %c0_32] : memref<1x256xf32, #tpu.memory_space<vmem>>, vector<1x256xf32>
    %70 = arith.mulf %68, %68 : vector<1x256xf32>
    %cst_33 = arith.constant dense<0.000000e+00> : vector<1xf32>
    %71 = vector.multi_reduction <add>, %70, %cst_33 [1] : vector<1x256xf32> to vector<1xf32>
    %72 = vector.shape_cast %71 : vector<1xf32> to vector<1x1xf32>
    %cst_34 = arith.constant 2.560000e+02 : f32
    %73 = vector.broadcast %cst_34 : f32 to vector<1x1xf32>
    %74 = arith.divf %72, %73 : vector<1x1xf32>
    %cst_35 = arith.constant 9.99999974E-6 : f32
    %75 = vector.broadcast %cst_35 : f32 to vector<1x1xf32>
    %76 = arith.addf %74, %75 : vector<1x1xf32>
    %77 = math.rsqrt %76 : vector<1x1xf32>
    %78 = vector.broadcast %77 : vector<1x1xf32> to vector<1x256xf32>
    %79 = arith.mulf %68, %78 : vector<1x256xf32>
    %80 = arith.mulf %79, %69 : vector<1x256xf32>
    %81 = arith.truncf %80 : vector<1x256xf32> to vector<1x256xbf16>
    %c0_36 = arith.constant 0 : index
    %c0_37 = arith.constant 0 : index
    %82 = vector.load %arg13[%c0_36, %c0_37] : memref<256x1024xbf16, #tpu.memory_space<vmem>>, vector<256x1024xbf16>
    %cst_38 = arith.constant dense<0.000000e+00> : vector<1x1024xf32>
    %83 = tpu.matmul %81, %82, %cst_38 {dimension_numbers = #tpu.dot_dimension_numbers<[1], [0], [0], [1], [0, 0, 1, 1], [], []>} : vector<1x256xbf16>, vector<256x1024xbf16>, vector<1x1024xf32> -> vector<1x1024xf32>
    %84 = vector.extract_strided_slice %83 {offsets = [0, 0], sizes = [1, 512], strides = [1, 1]} : vector<1x1024xf32> to vector<1x512xf32>
    %85 = vector.extract_strided_slice %83 {offsets = [0, 512], sizes = [1, 512], strides = [1, 1]} : vector<1x1024xf32> to vector<1x512xf32>
    %86 = arith.negf %84 : vector<1x512xf32>
    %87 = math.exp %86 : vector<1x512xf32>
    %cst_39 = arith.constant 1.000000e+00 : f32
    %88 = vector.broadcast %cst_39 : f32 to vector<1x512xf32>
    %89 = arith.addf %88, %87 : vector<1x512xf32>
    %90 = arith.divf %88, %89 : vector<1x512xf32>
    %91 = arith.mulf %84, %90 : vector<1x512xf32>
    %92 = arith.mulf %91, %85 : vector<1x512xf32>
    %93 = arith.truncf %92 : vector<1x512xf32> to vector<1x512xbf16>
    %c0_40 = arith.constant 0 : index
    %c0_41 = arith.constant 0 : index
    %94 = vector.load %arg14[%c0_40, %c0_41] : memref<512x256xbf16, #tpu.memory_space<vmem>>, vector<512x256xbf16>
    %cst_42 = arith.constant dense<0.000000e+00> : vector<1x256xf32>
    %95 = tpu.matmul %93, %94, %cst_42 {dimension_numbers = #tpu.dot_dimension_numbers<[1], [0], [0], [1], [0, 0, 1, 1], [], []>} : vector<1x512xbf16>, vector<512x256xbf16>, vector<1x256xf32> -> vector<1x256xf32>
    %96 = arith.addf %68, %95 : vector<1x256xf32>
    %c0_43 = arith.constant 0 : index
    %c0_44 = arith.constant 0 : index
    %97 = vector.load %arg15[%c0_43, %c0_44] : memref<1x256xf32, #tpu.memory_space<vmem>>, vector<1x256xf32>
    %98 = arith.mulf %96, %96 : vector<1x256xf32>
    %cst_45 = arith.constant dense<0.000000e+00> : vector<1xf32>
    %99 = vector.multi_reduction <add>, %98, %cst_45 [1] : vector<1x256xf32> to vector<1xf32>
    %100 = vector.shape_cast %99 : vector<1xf32> to vector<1x1xf32>
    %cst_46 = arith.constant 2.560000e+02 : f32
    %101 = vector.broadcast %cst_46 : f32 to vector<1x1xf32>
    %102 = arith.divf %100, %101 : vector<1x1xf32>
    %cst_47 = arith.constant 9.99999974E-6 : f32
    %103 = vector.broadcast %cst_47 : f32 to vector<1x1xf32>
    %104 = arith.addf %102, %103 : vector<1x1xf32>
    %105 = math.rsqrt %104 : vector<1x1xf32>
    %106 = vector.broadcast %105 : vector<1x1xf32> to vector<1x256xf32>
    %107 = arith.mulf %96, %106 : vector<1x256xf32>
    %108 = arith.mulf %107, %97 : vector<1x256xf32>
    %c0_48 = arith.constant 0 : index
    %c0_49 = arith.constant 0 : index
    %109 = vector.load %arg16[%c0_48, %c0_49] : memref<1x256xf32, #tpu.memory_space<vmem>>, vector<1x256xf32>
    tpu.vector_store %arg16[%c0_48, %c0_49], %108 {strides = array<i32>} : memref<1x256xf32, #tpu.memory_space<vmem>>, vector<1x256xf32>,
    %c0_50 = arith.constant 0 : index
    %c0_51 = arith.constant 0 : index
    %110 = vector.load %arg17[%c0_50, %c0_51] : memref<16x128xf32, #tpu.memory_space<vmem>>, vector<16x128xf32>
    tpu.vector_store %arg17[%c0_50, %c0_51], %29 {strides = array<i32>} : memref<16x128xf32, #tpu.memory_space<vmem>>, vector<16x128xf32>,
    %c0_52 = arith.constant 0 : index
    %c0_53 = arith.constant 0 : index
    %111 = vector.load %arg18[%c0_52, %c0_53] : memref<16x128xf32, #tpu.memory_space<vmem>>, vector<16x128xf32>
    tpu.vector_store %arg18[%c0_52, %c0_53], %31 {strides = array<i32>} : memref<16x128xf32, #tpu.memory_space<vmem>>, vector<16x128xf32>,
    return
  }
}

</mosaic_0001>

<bundles_post_ra>
// kernel: glm2_block_forward.1
= control target key start
LH: loop header
LB: loop body
LE: loop exit
PB: predicated region body
PF: predicated region fallthrough
CT: control target
= control target key end

     0   :  { %s4302_s0 = inlined_call_operand.vmem [shape: f32[8,256], index: 0, kind: input, shape index: {}]   ;;  %s4303_s1 = inlined_call_operand.vmem [shape: f32[1,16], index: 1, kind: input, shape index: {}]   ;;  %s4304_s2 = inlined_call_operand.vmem [shape: f32[8,128], index: 2, kind: input, shape index: {}]   ;;  %s4305_s3 = inlined_call_operand.vmem [shape: f32[8,128], index: 3, kind: input, shape index: {}]   ;;  %s4306_s4 = inlined_call_operand.vmem [shape: f32[1,256], index: 4, kind: input, shape index: {}]   ;;  %s4307_s5 = inlined_call_operand.vmem [shape: f32[1,256], index: 5, kind: input, shape index: {}]   ;;  %s4308_s6 = inlined_call_operand.vmem [shape: f32[8,128], index: 6, kind: input, shape index: {}]   ;;  %s4309_s7 = inlined_call_operand.vmem [shape: f32[8,128], index: 7, kind: input, shape index: {}]   ;;  %s4310_s8 = inlined_call_operand.hbm [shape: bf16[256,896], index: 8, kind: input, shape index: {}]   ;;  %s4311_s9 = inlined_call_operand.vmem [shape: f32[1,896], index: 9, kind: input, shape index: {}]   ;;  %s4312_s10 = inlined_call_operand.hbm [shape: bf16[256,256], index: 10, kind: input, shape index: {}]   ;;  %s4313_s11 = inlined_call_operand.vmem [shape: f32[1,256], index: 11, kind: input, shape index: {}]   ;;  %s4314_s12 = inlined_call_operand.vmem [shape: f32[1,256], index: 12, kind: input, shape index: {}]   ;;  %s4315_s13 = inlined_call_operand.hbm [shape: bf16[256,1024], index: 13, kind: input, shape index: {}]   ;;  %s4316_s14 = inlined_call_operand.vmem [shape: bf16[512,256], index: 14, kind: input, shape index: {}]   ;;  %s4317_s15 = inlined_call_operand.vmem [shape: f32[1,256], index: 15, kind: input, shape index: {}]   ;;  %s4318_s16 = inlined_call_operand.hbm [shape: f32[1,256], index: 16, kind: output, shape index: {0}]   ;;  %s4319_s17 = inlined_call_operand.vmem [shape: f32[16,128], index: 17, kind: output, shape index: {1}]   ;;  %s4320_s18 = inlined_call_operand.vmem [shape: f32[16,128], index: 18, kind: output, shape index: {2}]  }
   0x1   :  { %4322 = sst [smem:[#allocation12_spill]] %s4302_s0 }
   0x2   :  { %4323 = sst [smem:[#allocation13_spill]] %s4303_s1 }
   0x3   :  { %4324 = sst [smem:[#allocation14_spill]] %s4304_s2 }
   0x4   :  { %24 = vsyncpa [#allocation3], 0 }
   0x5   :  { %25 = vsyncpa [#allocation6], 0 }
   0x6   :  { %26 = vsyncpa [#allocation4], 0  ;;  %s3813_s27 = smov [#allocation5]   ;;  %s3719_s0 = scalar_lea.hbm %s4312_s10, 4096 }
   0x7   :  { %s62_s28 = sshll.u32 %s3813_s27, 4  ;;  %p3720_p0 = scmp.ne.s32.totalorder %s4312_s10, %s3719_s0  ;;  %s63_s28 = int_to_ptr.vmem [resolvable:$true] %s62_s28 }
   0x8   :  { %p3723_p1 = scmp.lt.u32.totalorder %s3719_s0, %s4312_s10 }
   0xa   :  { %p3725_p2 = pnand %p3723_p1, %p3720_p0 }
   0xc   :  { %3728 = shalt.err (!%p3725_p2)
}
   0xd   :  { %s3729_s22 = scalar_lea.vmem %s63_s28, 4096  ;;  %p3734_p4 = scmp.lt.s32.totalorder %s63_s28, %s63_s28 }
   0xe   :  { %p3730_p3 = scmp.ne.s32.totalorder %s63_s28, %s3729_s22  ;;  %p3735_p5 = scmp.lt.s32.totalorder %s3729_s22, %s3729_s22 }
  0x10   :  { %p3736_p6 = por %p3735_p5, %p3734_p4 }
  0x12   :  { %p3737_p7 = pnand %p3736_p6, %p3730_p3 }
  0x14   :  { %3740 = shalt.err (!%p3737_p7)
}
  0x15   :  { %s3814_s2 = smov 128   ;;  %s3815_s23 = smov 8  }
  0x16   :  { %68 = dma.hbm_to_vmem [thread:$0]  %s4312_s10, 4096, %s63_s28, [#allocation6], %s3814_s2, %s3814_s2, %s3815_s23  }
  0x17   :  { %s3816_s26 = smov [#allocation2]   ;;  %s3741_s0 = scalar_lea.hbm %s4310_s8, 14336 }
  0x18   :  { %s48_s27 = sshll.u32 %s3816_s26, 4  ;;  %p3742_p8 = scmp.ne.s32.totalorder %s4310_s8, %s3741_s0  ;;  %s49_s27 = int_to_ptr.vmem [resolvable:$true] %s48_s27 }
  0x19   :  { %p3745_p9 = scmp.lt.u32.totalorder %s3741_s0, %s4310_s8 }
  0x1b   :  { %p3747_p10 = pnand %p3745_p9, %p3742_p8 }
  0x1d   :  { %3750 = shalt.err (!%p3747_p10)
}
  0x1e   :  { %s3751_s22 = scalar_lea.vmem %s49_s27, 14336  ;;  %p3756_p12 = scmp.lt.s32.totalorder %s49_s27, %s49_s27 }
  0x1f   :  { %p3752_p11 = scmp.ne.s32.totalorder %s49_s27, %s3751_s22  ;;  %p3757_p13 = scmp.lt.s32.totalorder %s3751_s22, %s3751_s22 }
  0x21   :  { %p3758_p0 = por %p3757_p13, %p3756_p12 }
  0x23   :  { %p3759_p1 = pnand %p3758_p0, %p3752_p11 }
  0x25   :  { %3762 = shalt.err (!%p3759_p1)
}
  0x26   :  { %s3817_s10 = smov 448   ;;  %s3818_s28 = smov 28  }
  0x27   :  { %54 = dma.hbm_to_vmem [thread:$0]  %s4310_s8, 14336, %s49_s27, [#allocation3], %s3817_s10, %s3817_s10, %s3818_s28  }
  0x28   :  { %s3819_s24 = smov [#allocation7]   ;;  %s3763_s30 = scalar_lea.hbm %s4315_s13, 16384 }
  0x29   :  { %s78_s25 = sshll.u32 %s3819_s24, 4  ;;  %p3764_p2 = scmp.ne.s32.totalorder %s4315_s13, %s3763_s30  ;;  %s79_s25 = int_to_ptr.vmem [resolvable:$true] %s78_s25 }
  0x2a   :  { %p3767_p3 = scmp.lt.u32.totalorder %s3763_s30, %s4315_s13 }
  0x2c   :  { %p3769_p4 = pnand %p3767_p3, %p3764_p2 }
  0x2e   :  { %3772 = shalt.err (!%p3769_p4)
}
  0x2f   :  { %s3773_s21 = scalar_lea.vmem %s79_s25, 16384  ;;  %p3778_p6 = scmp.lt.s32.totalorder %s79_s25, %s79_s25 }
  0x30   :  { %p3774_p5 = scmp.ne.s32.totalorder %s79_s25, %s3773_s21  ;;  %p3779_p7 = scmp.lt.s32.totalorder %s3773_s21, %s3773_s21 }
  0x32   :  { %p3780_p8 = por %p3779_p7, %p3778_p6 }
  0x34   :  { %p3781_p9 = pnand %p3780_p8, %p3774_p5 }
  0x36   :  { %3784 = shalt.err (!%p3781_p9)
}
  0x37   :  { %s3820_s8 = smov 512   ;;  %s3821_s27 = smov 32  }
  0x38   :  { %84 = dma.hbm_to_vmem [thread:$0]  %s4315_s13, 16384, %s79_s25, [#allocation6], %s3820_s8, %s3820_s8, %s3821_s27  }
  0x39   :  { %3807 = dma.done.wait [#allocation3], 14336  }
  0x3a   :  { %3808 = vsyncadd [#allocation3], 4294952960 }
  0x3b   :  { %3809 = dma.done.wait [#allocation6], 20480  }
  0x3c   :  { %3810 = vsyncadd [#allocation6], 4294946816  ;;  %s4325_s23 = sld [smem:[#allocation12_spill]]  ;;  %v3387_v4 = vld [vmem:[#allocation2 + $0x4] ss:$28 sps:$4 sm:$0xff]   ;;  %vm3823_vm0 = vmmov 0  }
  0x3d   :  { %v3389_v5 = vld [vmem:[#allocation2 + $0x14] ss:$28 sps:$4 sm:$0xff]   ;;  %v3391_v6 = vld [vmem:[#allocation2] ss:$28 sps:$4 sm:$0xff]   ;;  %869 = vmatprep.subr.bf16.mxu1 %v3387_v4  ;;  %v3395_v10 = vld [vmem:[#allocation2 + $0x4c] ss:$28 sps:$4 sm:$0xff]  }
  0x3e   :  { %v3392_v8 = vld [vmem:[#allocation2 + $0x10] ss:$28 sps:$4 sm:$0xff]   ;;  %951 = vmatprep.subr.bf16.mxu0 %v3389_v5  ;;  %870 = vmatpush1.bf16.msra.mxu1 %v3391_v6  ;;  %v3393_v9 = vld [vmem:[#allocation2 + $0x3c] ss:$28 sps:$4 sm:$0xff]   ;;  %v3398_v12 = vld [vmem:[#allocation2 + $0x48] ss:$28 sps:$4 sm:$0xff]  }
  0x3f   :  { %952 = vmatpush1.bf16.msra.mxu0 %v3392_v8  ;;  %v3397_v11 = vld [vmem:[#allocation2 + $0x38] ss:$28 sps:$4 sm:$0xff]   ;;  %871 = vmatprep.subr.bf16.mxu1 %v3393_v9  ;;  %v3401_v14 = vld [vmem:[#allocation2 + $0x84] ss:$28 sps:$4 sm:$0xff]   ;;  %v3403_v15 = vld [vmem:[#allocation2 + $0x70] ss:$28 sps:$4 sm:$0xff]  }
  0x40   :  { %v3399_v13 = vld [vmem:[#allocation2 + $0x74] ss:$28 sps:$4 sm:$0xff]   ;;  %953 = vmatprep.subr.bf16.mxu0 %v3395_v10  ;;  %v3404_v16 = vld [vmem:[#allocation2 + $0x80] ss:$28 sps:$4 sm:$0xff]   ;;  %v3405_v17 = vld [vmem:[#allocation2 + $0xac] ss:$28 sps:$4 sm:$0xff]  }
  0x41   :  { %v3407_v18 = vld [vmem:[#allocation2 + $0xbc] ss:$28 sps:$4 sm:$0xff]   ;;  %v3409_v19 = vld [vmem:[#allocation2 + $0xa8] ss:$28 sps:$4 sm:$0xff]   ;;  %v3413_v22 = vld [vmem:[#allocation2 + $0xf4] ss:$28 sps:$4 sm:$0xff]  }
  0x42   :  { %v3960_v0 = vld [vmem:[%s4325_s23] sm:$0xff]  ;;  %v3965_v1 = vld [vmem:[%s4325_s23 + $0x8] sm:$0xff]  ;;  %872 = vmatpush1.bf16.msra.mxu1 %v3397_v11  ;;  %v3410_v20 = vld [vmem:[#allocation2 + $0xb8] ss:$28 sps:$4 sm:$0xff]   ;;  %v114_v11 = vlaneseq  ;;  %vm1075_vm1 = vcmask 1040384   ;;  %s4326_s2 = sld [smem:[#allocation14_spill]] }
  0x43   :  { %v102_v2 = vmul.f32 %v3960_v0, %v3960_v0  ;;  %v103_v3 = vmul.f32 %v3965_v1, %v3965_v1  ;;  %954 = vmatpush1.bf16.msra.mxu0 %v3398_v12  ;;  %873 = vmatprep.subr.bf16.mxu1 %v3399_v13  ;;  %v3411_v21 = vld [vmem:[#allocation2 + $0xe4] ss:$28 sps:$4 sm:$0xff]   ;;  %v3416_v24 = vld [vmem:[#allocation2 + $0xf0] ss:$28 sps:$4 sm:$0xff]   ;;  %v3417_v25 = vld [vmem:[#allocation2 + $0x11c] ss:$28 sps:$4 sm:$0xff]  }
  0x44   :  { %955 = vmatprep.subr.bf16.mxu0 %v3401_v14  ;;  %v3415_v23 = vld [vmem:[#allocation2 + $0xe0] ss:$28 sps:$4 sm:$0xff]   ;;  %v3419_v26 = vld [vmem:[#allocation2 + $0x12c] ss:$28 sps:$4 sm:$0xff]   ;;  %v3421_v27 = vld [vmem:[#allocation2 + $0x118] ss:$28 sps:$4 sm:$0xff]  }
  0x45   :  { %v104_v7 = vadd.f32 %v103_v3, %v102_v2  ;;  %v3422_v28 = vld [vmem:[#allocation2 + $0x128] ss:$28 sps:$4 sm:$0xff]   ;;  %v3423_v29 = vld [vmem:[#allocation2 + $0x154] ss:$28 sps:$4 sm:$0xff]   ;;  %v3428_v32 = vld [vmem:[#allocation2 + $0x160] ss:$28 sps:$4 sm:$0xff]  }
  0x46   :  { %874 = vmatpush1.bf16.msra.mxu1 %v3403_v15  ;;  %v3425_v30 = vld [vmem:[#allocation2 + $0x164] ss:$28 sps:$4 sm:$0xff]   ;;  %v3427_v31 = vld [vmem:[#allocation2 + $0x150] ss:$28 sps:$4 sm:$0xff]   ;;  %v3431_v34 = vld [vmem:[#allocation2 + $0x19c] ss:$28 sps:$4 sm:$0xff]  }
  0x47   :  { %105 = vadd.xlane.f32.xlu0 %v104_v7  ;;  %956 = vmatpush1.bf16.msra.mxu0 %v3404_v16  ;;  %v3429_v33 = vld [vmem:[#allocation2 + $0x18c] ss:$28 sps:$4 sm:$0xff]   ;;  %v3434_v36 = vld [vmem:[#allocation2 + $0x198] ss:$28 sps:$4 sm:$0xff]   ;;  %v3435_v37 = vld [vmem:[#allocation2 + $0x1c4] ss:$28 sps:$4 sm:$0xff]  }
  0x48   :  { %875 = vmatprep.subr.bf16.mxu1 %v3405_v17  ;;  %957 = vmatprep.subr.bf16.mxu0 %v3407_v18  ;;  %v3433_v35 = vld [vmem:[#allocation2 + $0x188] ss:$28 sps:$4 sm:$0xff]   ;;  %v3437_v38 = vld [vmem:[#allocation2 + $0x1d4] ss:$28 sps:$4 sm:$0xff]   ;;  %v3439_v39 = vld [vmem:[#allocation2 + $0x1c0] ss:$28 sps:$4 sm:$0xff]  }
  0x49   :  { %v3440_v40 = vld [vmem:[#allocation2 + $0x1d0] ss:$28 sps:$4 sm:$0xff]   ;;  %v3441_v41 = vld [vmem:[#allocation2 + $0x1fc] ss:$28 sps:$4 sm:$0xff]   ;;  %v3446_v44 = vld [vmem:[#allocation2 + $0x208] ss:$28 sps:$4 sm:$0xff]  }
  0x4a   :  { %876 = vmatpush1.bf16.msra.mxu1 %v3409_v19  ;;  %v3443_v42 = vld [vmem:[#allocation2 + $0x20c] ss:$28 sps:$4 sm:$0xff]   ;;  %v3445_v43 = vld [vmem:[#allocation2 + $0x1f8] ss:$28 sps:$4 sm:$0xff]   ;;  %v3449_v46 = vld [vmem:[#allocation2 + $0x244] ss:$28 sps:$4 sm:$0xff]  }
  0x4b   :  { %958 = vmatpush1.bf16.msra.mxu0 %v3410_v20  ;;  %877 = vmatprep.subr.bf16.mxu1 %v3411_v21  ;;  %v3447_v45 = vld [vmem:[#allocation2 + $0x234] ss:$28 sps:$4 sm:$0xff]   ;;  %v3452_v48 = vld [vmem:[#allocation2 + $0x240] ss:$28 sps:$4 sm:$0xff]   ;;  %v3453_v49 = vld [vmem:[#allocation2 + $0x26c] ss:$28 sps:$4 sm:$0xff]  }
  0x4c   :  { %959 = vmatprep.subr.bf16.mxu0 %v3413_v22  ;;  %v3451_v47 = vld [vmem:[#allocation2 + $0x230] ss:$28 sps:$4 sm:$0xff]   ;;  %v3455_v50 = vld [vmem:[#allocation2 + $0x27c] ss:$28 sps:$4 sm:$0xff]   ;;  %v3457_v51 = vld [vmem:[#allocation2 + $0x268] ss:$28 sps:$4 sm:$0xff]  }
  0x4d   :  { %v3458_v52 = vld [vmem:[#allocation2 + $0x278] ss:$28 sps:$4 sm:$0xff]   ;;  %v3459_v53 = vld [vmem:[#allocation2 + $0x2a4] ss:$28 sps:$4 sm:$0xff]   ;;  %v3464_v56 = vld [vmem:[#allocation2 + $0x2b0] ss:$28 sps:$4 sm:$0xff]  }
  0x4e   :  { %878 = vmatpush1.bf16.msra.mxu1 %v3415_v23  ;;  %v3461_v54 = vld [vmem:[#allocation2 + $0x2b4] ss:$28 sps:$4 sm:$0xff]   ;;  %v3463_v55 = vld [vmem:[#allocation2 + $0x2a0] ss:$28 sps:$4 sm:$0xff]   ;;  %v3467_v58 = vld [vmem:[#allocation2 + $0x2ec] ss:$28 sps:$4 sm:$0xff]  }
  0x4f   :  { %960 = vmatpush1.bf16.msra.mxu0 %v3416_v24  ;;  %879 = vmatprep.subr.bf16.mxu1 %v3417_v25  ;;  %v3465_v57 = vld [vmem:[#allocation2 + $0x2dc] ss:$28 sps:$4 sm:$0xff]   ;;  %v3470_v60 = vld [vmem:[#allocation2 + $0x2e8] ss:$28 sps:$4 sm:$0xff]   ;;  %v3471_v61 = vld [vmem:[#allocation2 + $0x314] ss:$28 sps:$4 sm:$0xff]  }
  0x50   :  { %961 = vmatprep.subr.bf16.mxu0 %v3419_v26  ;;  %v3469_v59 = vld [vmem:[#allocation2 + $0x2d8] ss:$28 sps:$4 sm:$0xff]   ;;  %v3473_v62 = vld [vmem:[#allocation2 + $0x324] ss:$28 sps:$4 sm:$0xff]   ;;  %v3475_v63 = vld [vmem:[#allocation2 + $0x310] ss:$28 sps:$4 sm:$0xff]  }
  0x51   :  { %v3476_v2 = vld [vmem:[#allocation2 + $0x320] ss:$28 sps:$4 sm:$0xff]   ;;  %v3477_v3 = vld [vmem:[#allocation2 + $0x34c] ss:$28 sps:$4 sm:$0xff]   ;;  %v3482_v6 = vld [vmem:[#allocation2 + $0x358] ss:$28 sps:$4 sm:$0xff]  }
  0x52   :  { %880 = vmatpush1.bf16.msra.mxu1 %v3421_v27  ;;  %v3479_v4 = vld [vmem:[#allocation2 + $0x35c] ss:$28 sps:$4 sm:$0xff]   ;;  %v3481_v5 = vld [vmem:[#allocation2 + $0x348] ss:$28 sps:$4 sm:$0xff]   ;;  %v3972_v13 = vshrl.u32 %v114_v11, 7  ;;  %vm1126_vm2 = vcmask 123904  }
  0x53   :  { %962 = vmatpush1.bf16.msra.mxu0 %v3422_v28  ;;  %881 = vmatprep.subr.bf16.mxu1 %v3423_v29  ;;  %v3485_v7 = vld [vmem:[#allocation2 + $0xc] ss:$28 sps:$4 sm:$0xff]   ;;  %v3486_v8 = vld [vmem:[#allocation2 + $0x1d8] ss:$28 sps:$4 sm:$0xff]   ;;  %v101_v16 = vld [vmem:[%s4313_s11] sm:$0x3] }
  0x54   :  { %963 = vmatprep.subr.bf16.mxu0 %v3425_v30  ;;  %v3975_v14 = vsub.s32 1, %v3972_v13  ;;  %v3978_v15 = vsub.s32 0, %v3972_v13  ;;  %v3483_v25 = vld [vmem:[#allocation2 + $0x8] ss:$28 sps:$4 sm:$0xff]   ;;  %v3487_v27 = vld [vmem:[#allocation2 + $0x18] ss:$28 sps:$4 sm:$0xff]  }
  0x55   :  { %v3490_v28 = vld [vmem:[#allocation2 + $0x44] ss:$28 sps:$4 sm:$0xff]   ;;  %v3491_v29 = vld [vmem:[#allocation2 + $0x210] ss:$28 sps:$4 sm:$0xff]   ;;  %s4327_s11 = sld [smem:[#allocation13_spill]]  ;;  %vm1140_vm3 = vcmask 130048  }
  0x56   :  { %882 = vmatpush1.bf16.msra.mxu1 %v3427_v31  ;;  %v121_v17 = vrot.slane %v101_v16, %v3975_v14  ;;  %v117_v18 = vrot.slane %v101_v16, %v3978_v15  ;;  %v3492_v30 = vld [vmem:[#allocation2 + $0x50] ss:$28 sps:$4 sm:$0xff]   ;;  %v3496_v31 = vld [vmem:[#allocation2 + $0x248] ss:$28 sps:$4 sm:$0xff]   ;;  %vm1433_vm4 = vcmask 1047559   ;;  %vm2959_vm5 = vcmp.lt.s32.totalorder %v114_v11, 256 }
  0x57   :  { %964 = vmatpush1.bf16.msra.mxu0 %v3428_v32  ;;  %883 = vmatprep.subr.bf16.mxu1 %v3429_v33  ;;  %v3493_v32 = vld [vmem:[#allocation2 + $0x78] ss:$28 sps:$4 sm:$0xff]   ;;  %v3497_v33 = vld [vmem:[#allocation2 + $0x88] ss:$28 sps:$4 sm:$0xff]  }
  0x58   :  { %965 = vmatprep.subr.bf16.mxu0 %v3431_v34  ;;  %v3500_v34 = vld [vmem:[#allocation2 + $0xb4] ss:$28 sps:$4 sm:$0xff]   ;;  %v256_v16 = vld [vmem:[%s4311_s9] sm:$0xff] }
  0x5a   :  { %884 = vmatpush1.bf16.msra.mxu1 %v3433_v35  ;;  %v3501_v35 = vld [vmem:[#allocation2 + $0x280] ss:$28 sps:$4 sm:$0xff]  }
  0x5b   :  { %966 = vmatpush1.bf16.msra.mxu0 %v3434_v36  ;;  %885 = vmatprep.subr.bf16.mxu1 %v3435_v37  ;;  %v3498_v36 = vld [vmem:[#allocation2 + $0xb0] ss:$28 sps:$4 sm:$0xff]   ;;  %v3502_v37 = vld [vmem:[#allocation2 + $0xc0] ss:$28 sps:$4 sm:$0xff]  }
  0x5c   :  { %967 = vmatprep.subr.bf16.mxu0 %v3437_v38  ;;  %v3505_v38 = vld [vmem:[#allocation2 + $0xec] ss:$28 sps:$4 sm:$0xff]  }
  0x5e   :  { %886 = vmatpush1.bf16.msra.mxu1 %v3439_v39  ;;  %v3506_v39 = vld [vmem:[#allocation2 + $0x2b8] ss:$28 sps:$4 sm:$0xff]  }
  0x5f   :  { %968 = vmatpush1.bf16.msra.mxu0 %v3440_v40  ;;  %887 = vmatprep.subr.bf16.mxu1 %v3441_v41  ;;  %v3503_v40 = vld [vmem:[#allocation2 + $0xe8] ss:$28 sps:$4 sm:$0xff]   ;;  %v3507_v41 = vld [vmem:[#allocation2 + $0xf8] ss:$28 sps:$4 sm:$0xff]  }
  0x60   :  { %969 = vmatprep.subr.bf16.mxu0 %v3443_v42  ;;  %v3510_v42 = vld [vmem:[#allocation2 + $0x124] ss:$28 sps:$4 sm:$0xff]  }
  0x62   :  { %888 = vmatpush1.bf16.msra.mxu1 %v3445_v43  ;;  %v3511_v43 = vld [vmem:[#allocation2 + $0x2f0] ss:$28 sps:$4 sm:$0xff]  }
  0x63   :  { %970 = vmatpush1.bf16.msra.mxu0 %v3446_v44  ;;  %889 = vmatprep.subr.bf16.mxu1 %v3447_v45  ;;  %v3508_v44 = vld [vmem:[#allocation2 + $0x120] ss:$28 sps:$4 sm:$0xff]   ;;  %v3512_v45 = vld [vmem:[#allocation2 + $0x130] ss:$28 sps:$4 sm:$0xff]  }
  0x64   :  { %971 = vmatprep.subr.bf16.mxu0 %v3449_v46  ;;  %v3515_v46 = vld [vmem:[#allocation2 + $0x15c] ss:$28 sps:$4 sm:$0xff]  }
  0x66   :  { %890 = vmatpush1.bf16.msra.mxu1 %v3451_v47  ;;  %v3516_v47 = vld [vmem:[#allocation2 + $0x328] ss:$28 sps:$4 sm:$0xff]  }
  0x67   :  { %972 = vmatpush1.bf16.msra.mxu0 %v3452_v48  ;;  %891 = vmatprep.subr.bf16.mxu1 %v3453_v49  ;;  %v3513_v48 = vld [vmem:[#allocation2 + $0x158] ss:$28 sps:$4 sm:$0xff]   ;;  %v3517_v49 = vld [vmem:[#allocation2 + $0x168] ss:$28 sps:$4 sm:$0xff]  }
  0x68   :  { %973 = vmatprep.subr.bf16.mxu0 %v3455_v50  ;;  %v3520_v50 = vld [vmem:[#allocation2 + $0x194] ss:$28 sps:$4 sm:$0xff]  }
  0x6a   :  { %892 = vmatpush1.bf16.msra.mxu1 %v3457_v51  ;;  %v3521_v51 = vld [vmem:[#allocation2 + $0x360] ss:$28 sps:$4 sm:$0xff]  }
  0x6b   :  { %974 = vmatpush1.bf16.msra.mxu0 %v3458_v52  ;;  %893 = vmatprep.subr.bf16.mxu1 %v3459_v53  ;;  %v3518_v52 = vld [vmem:[#allocation2 + $0x190] ss:$28 sps:$4 sm:$0xff]   ;;  %v3522_v53 = vld [vmem:[#allocation2 + $0x1a0] ss:$28 sps:$4 sm:$0xff]  }
  0x6c   :  { %975 = vmatprep.subr.bf16.mxu0 %v3461_v54  ;;  %v3525_v54 = vld [vmem:[#allocation2 + $0x1cc] ss:$28 sps:$4 sm:$0xff]  }
  0x6e   :  { %894 = vmatpush1.bf16.msra.mxu1 %v3463_v55  ;;  %v3523_v55 = vld [vmem:[#allocation2 + $0x1c8] ss:$28 sps:$4 sm:$0xff]  }
  0x6f   :  { %976 = vmatpush1.bf16.msra.mxu0 %v3464_v56  ;;  %895 = vmatprep.subr.bf16.mxu1 %v3465_v57  ;;  %v3528_v56 = vld [vmem:[#allocation2 + $0x204] ss:$28 sps:$4 sm:$0xff]  }
  0x70   :  { %977 = vmatprep.subr.bf16.mxu0 %v3467_v58  ;;  %v3526_v57 = vld [vmem:[#allocation2 + $0x200] ss:$28 sps:$4 sm:$0xff]  }
  0x71   :  { %v3531_v58 = vld [vmem:[#allocation2 + $0x23c] ss:$28 sps:$4 sm:$0xff]  }
  0x72   :  { %896 = vmatpush1.bf16.msra.mxu1 %v3469_v59  ;;  %v3529_v59 = vld [vmem:[#allocation2 + $0x238] ss:$28 sps:$4 sm:$0xff]  }
  0x73   :  { %978 = vmatpush1.bf16.msra.mxu0 %v3470_v60  ;;  %897 = vmatprep.subr.bf16.mxu1 %v3471_v61  ;;  %v3534_v60 = vld [vmem:[#allocation2 + $0x274] ss:$28 sps:$4 sm:$0xff]  }
  0x74   :  { %979 = vmatprep.subr.bf16.mxu0 %v3473_v62  ;;  %v3532_v61 = vld [vmem:[#allocation2 + $0x270] ss:$28 sps:$4 sm:$0xff]  }
  0x75   :  { %v3537_v62 = vld [vmem:[#allocation2 + $0x2ac] ss:$28 sps:$4 sm:$0xff]  }
  0x76   :  { %898 = vmatpush1.bf16.msra.mxu1 %v3475_v63  ;;  %v3535_v63 = vld [vmem:[#allocation2 + $0x2a8] ss:$28 sps:$4 sm:$0xff]  }
  0x77   :  { %980 = vmatpush1.bf16.msra.mxu0 %v3476_v2  ;;  %899 = vmatprep.subr.bf16.mxu1 %v3477_v3  ;;  %v3540_v2 = vld [vmem:[#allocation2 + $0x2e4] ss:$28 sps:$4 sm:$0xff]  }
  0x78   :  { %981 = vmatprep.subr.bf16.mxu0 %v3479_v4  ;;  %v3538_v3 = vld [vmem:[#allocation2 + $0x2e0] ss:$28 sps:$4 sm:$0xff]  }
  0x79   :  { %v3543_v4 = vld [vmem:[#allocation2 + $0x31c] ss:$28 sps:$4 sm:$0xff]  }
  0x7a   :  { %900 = vmatpush1.bf16.msra.mxu1 %v3481_v5  ;;  %v3541_v5 = vld [vmem:[#allocation2 + $0x318] ss:$28 sps:$4 sm:$0xff]  }
  0x7b   :  { %982 = vmatpush1.bf16.msra.mxu0 %v3482_v6  ;;  %910 = vmatprep.subr.bf16.mxu1 %v3485_v7  ;;  %v3546_v6 = vld [vmem:[#allocation2 + $0x354] ss:$28 sps:$4 sm:$0xff]  }
  0x7c   :  { %3332 = vmatprep.subr.bf16.mxu0 %v3486_v8  ;;  %v3544_v7 = vld [vmem:[#allocation2 + $0x350] ss:$28 sps:$4 sm:$0xff]   ;;  %v3996_v8 = vld [vmem:[%s4309_s7] sm:$0xff] }
  0x7d   :  { %2964 = vst [vmem:[%s4320_s18] sm:$0xff] %v3996_v8 }
  0xd4   :  { %v106_v9 = vpop.xlane.xlu0 %105 }
  0xd5   :  { %v108_v10 = vmul.f32 0.00390625, %v106_v9  ;;  %v4005_v9 = vld [vmem:[%s4308_s6] sm:$0xff] }
  0xd6   :  { %2962 = vst [vmem:[%s4319_s17] sm:$0xff] %v4005_v9 }
  0xd7   :  { %v109_v12 = vadd.f32 1e-05, %v108_v10  ;;  %v3822_v10 = vmov 0.0  }
  0xd9   :  { %3691 = vrsqrt.f32 %v109_v12  ;;  %v276_v12 = vsub.s32 4, %v3972_v13 }
  0xe3   :  { %v3692_v19 = vpop.eup %3691 }
  0xe4   :  { %v112_v20 = vmul.f32 %v3692_v19, %v3965_v1  ;;  %v111_v21 = vmul.f32 %v3692_v19, %v3960_v0  ;;  %v3488_v1 = vld [vmem:[#allocation2 + $0x40] ss:$28 sps:$4 sm:$0xff]  }
  0xe5   :  { %v3495_v0 = vld [vmem:[#allocation2 + $0x7c] ss:$28 sps:$4 sm:$0xff]   ;;  %v1053_v19 = vld [vmem:[%s4307_s5] sm:$0x3] }
  0xe6   :  { %v125_v22 = vmul.f32 %v121_v17, %v112_v20  ;;  %v124_v23 = vmul.f32 %v117_v18, %v111_v21  ;;  %v280_v17 = vsub.s32 5, %v3972_v13  ;;  %v1039_v18 = vld [vmem:[%s4306_s4] sm:$0x3]  ;;  %v261_v20 = vrot.slane %v256_v16, %v3978_v15 }
  0xe7   :  { %v277_v21 = vrot.slane %v256_v16, %v276_v12 }
  0xe8   :  { %v127_v24 = vpack.c.bf16 %v125_v22, %v125_v22  ;;  %v3987_v26 = vpack.c.bf16 %v124_v23, %v124_v23  ;;  %v265_v22 = vrot.slane %v256_v16, %v3975_v14  ;;  %v281_v23 = vrot.slane %v256_v16, %v280_v17 }
  0xea   :  { %901 = vmatprep.mubr.bf16.mxu1 %v127_v24  ;;  %983 = vmatprep.mubr.bf16.mxu0 %v127_v24 }
  0xeb   :  { %902 = vmatmul.mubr.bf16.vlgmr.msra.gmra.mrb[0].mxu1 %v3987_v26  ;;  %984 = vmatmul.mubr.bf16.vlgmr.msra.gmra.mrb[0].mxu0 %v3987_v26 }
  0xec   :  { %911 = vmatpush1.bf16.msra.mxu1 %v3483_v25  ;;  %3333 = vmatpush3.bf16.msra.mxu0 %v3487_v27  ;;  %v1058_v25 = vrot.slane %v1053_v19, %v3978_v15 }
  0xed   :  { %942 = vmatprep.mubr.bf16.mxu1 %v127_v24  ;;  %1024 = vmatprep.mubr.bf16.mxu0 %v127_v24  ;;  %v1044_v24 = vrot.slane %v1039_v18, %v3978_v15 }
  0xee   :  { %912 = vmatprep.subr.bf16.mxu1 %v3490_v28  ;;  %3334 = vmatprep.subr.bf16.mxu0 %v3491_v29  ;;  %v1048_v28 = vrot.slane %v1039_v18, %v3975_v14  ;;  %v1062_v29 = vrot.slane %v1053_v19, %v3975_v14  ;;  %v3102_v18 = vld [vmem:[%s4327_s11] ss:$0 sm:$0xff] }
  0xf0   :  { %913 = vmatpush1.bf16.msra.mxu1 %v3488_v1  ;;  %3335 = vmatpush3.bf16.msra.mxu0 %v3492_v30 }
  0xf1   :  { %914 = vmatprep.subr.bf16.mxu1 %v3495_v0  ;;  %3336 = vmatprep.subr.bf16.mxu0 %v3496_v31 }
  0xf4   :  { %915 = vmatpush1.bf16.msra.mxu1 %v3493_v32  ;;  %3337 = vmatpush3.bf16.msra.mxu0 %v3497_v33 }
  0xf5   :  { %916 = vmatprep.subr.bf16.mxu1 %v3500_v34  ;;  %3338 = vmatprep.subr.bf16.mxu0 %v3501_v35 }
  0xf8   :  { %917 = vmatpush1.bf16.msra.mxu1 %v3498_v36  ;;  %3339 = vmatpush3.bf16.msra.mxu0 %v3502_v37 }
  0xf9   :  { %918 = vmatprep.subr.bf16.mxu1 %v3505_v38  ;;  %3340 = vmatprep.subr.bf16.mxu0 %v3506_v39 }
  0xfc   :  { %919 = vmatpush1.bf16.msra.mxu1 %v3503_v40  ;;  %3341 = vmatpush3.bf16.msra.mxu0 %v3507_v41 }
  0xfd   :  { %920 = vmatprep.subr.bf16.mxu1 %v3510_v42  ;;  %3342 = vmatprep.subr.bf16.mxu0 %v3511_v43 }
 0x100   :  { %921 = vmatpush1.bf16.msra.mxu1 %v3508_v44  ;;  %3343 = vmatpush3.bf16.msra.mxu0 %v3512_v45 }
 0x101   :  { %922 = vmatprep.subr.bf16.mxu1 %v3515_v46  ;;  %3344 = vmatprep.subr.bf16.mxu0 %v3516_v47 }
 0x104   :  { %923 = vmatpush1.bf16.msra.mxu1 %v3513_v48  ;;  %3345 = vmatpush3.bf16.msra.mxu0 %v3517_v49 }
 0x105   :  { %924 = vmatprep.subr.bf16.mxu1 %v3520_v50  ;;  %3346 = vmatprep.subr.bf16.mxu0 %v3521_v51 }
 0x108   :  { %925 = vmatpush1.bf16.msra.mxu1 %v3518_v52  ;;  %3347 = vmatpush3.bf16.msra.mxu0 %v3522_v53  ;;  %v284_v52 = vsub.s32 6, %v3972_v13  ;;  %v268_v53 = vsub.s32 2, %v3972_v13 }
 0x109   :  { %926 = vmatprep.subr.bf16.mxu1 %v3525_v54  ;;  %v272_v54 = vsub.s32 3, %v3972_v13 }
 0x10b   :  { %1025 = vmatmul.mubr.bf16.vlgmr.msra.gmra.mrb[4].mxu0 %v3987_v26 }
 0x10c   :  { %927 = vmatpush1.bf16.msra.mxu1 %v3523_v55  ;;  %v285_v55 = vrot.slane %v256_v16, %v284_v52  ;;  %v3580_v52 = vld [vmem:[#allocation5 + $0xb0] ss:$8 sps:$4 sm:$0xff]  }
 0x10d   :  { %928 = vmatprep.subr.bf16.mxu1 %v3528_v56  ;;  %v269_v56 = vrot.slane %v256_v16, %v268_v53  ;;  %v3585_v53 = vld [vmem:[#allocation5 + $0xc4] ss:$8 sps:$4 sm:$0xff]  }
 0x110   :  { %929 = vmatpush1.bf16.msra.mxu1 %v3526_v57  ;;  %v273_v57 = vrot.slane %v256_v16, %v272_v54  ;;  %v3583_v54 = vld [vmem:[#allocation5 + $0xc0] ss:$8 sps:$4 sm:$0xff]  }
 0x111   :  { %930 = vmatprep.subr.bf16.mxu1 %v3531_v58 }
 0x114   :  { %931 = vmatpush1.bf16.msra.mxu1 %v3529_v59  ;;  %v1034_v59 = vld [vmem:[%s4305_s3] sm:$0xff]  ;;  %s3825_s3 = smov [#allocation8]  }
 0x115   :  { %932 = vmatprep.subr.bf16.mxu1 %v3534_v60  ;;  %s2972_s13 = sshll.u32 %s3825_s3, 4  ;;  %s2973_s13 = int_to_ptr.vmem [resolvable:$true] %s2972_s13 }
 0x116   :  { %p3790_p11 = scmp.lt.s32.totalorder %s2973_s13, %s2973_s13 }
 0x118   :  { %933 = vmatpush1.bf16.msra.mxu1 %v3532_v61  ;;  %v1032_v61 = vld [vmem:[%s4326_s2] sm:$0xff] }
 0x119   :  { %934 = vmatprep.subr.bf16.mxu1 %v3537_v62 }
 0x11c   :  { %935 = vmatpush1.bf16.msra.mxu1 %v3535_v63 }
 0x11d   :  { %936 = vmatprep.subr.bf16.mxu1 %v3540_v2 }
 0x120   :  { %937 = vmatpush1.bf16.msra.mxu1 %v3538_v3 }
 0x121   :  { %938 = vmatprep.subr.bf16.mxu1 %v3543_v4 }
 0x124   :  { %939 = vmatpush1.bf16.msra.mxu1 %v3541_v5 }
 0x125   :  { %940 = vmatprep.subr.bf16.mxu1 %v3546_v6 }
 0x128   :  { %941 = vmatpush1.bf16.msra.mxu1 %v3544_v7 }
 0x129   :  { %3358 = vmatprep.subr.bf16.mxu1 %v3822_v10 }
 0x12b   :  { %943 = vmatmul.mubr.bf16.vlgmr.msra.gmra.mrb[4].mxu1 %v3987_v26 }
 0x12c   :  { %3360 = vmatprep.mubr.msk.bf16.mxu1 %vm3823_vm0, %v3822_v10 }
 0x1be   :  { %v903_v26 = vpop.f32.mrb[0].mxu1  ;;  %v985_v27 = vpop.f32.mrb[0].mxu0 }
 0x1bf   :  { %v904_v1 = vadd.f32 %v903_v26, %v261_v20  ;;  %v986_v30 = vadd.f32 %v985_v27, %v277_v21  ;;  %v905_v0 = vpop.f32.mrb[1].mxu1  ;;  %v987_v31 = vpop.f32.mrb[1].mxu0 }
 0x1c0   :  { %v906_v32 = vadd.f32 %v905_v0, %v265_v22  ;;  %v988_v33 = vadd.f32 %v987_v31, %v281_v23  ;;  %v907_v34 = vpop.f32.mrb[2].mxu1  ;;  %v989_v35 = vpop.f32.mrb[2].mxu0  ;;  %v3552_v31 = vld [vmem:[#allocation5 + $0x14] ss:$8 sps:$4 sm:$0xff]  }
 0x1c1   :  { %v1051_v36 = vmul.f32 %v1044_v24, %v904_v1  ;;  %v1065_v37 = vmul.f32 %v1058_v25, %v986_v30  ;;  %v908_v38 = vpop.f32.mrb[3].mxu1  ;;  %v990_v39 = vpop.f32.mrb[3].mxu0  ;;  %v3547_v30 = vld [vmem:[#allocation5] ss:$8 sps:$4 sm:$0xff]   ;;  %v3558_v35 = vld [vmem:[#allocation5 + $0x34] ss:$8 sps:$4 sm:$0xff]  }
 0x1c2   :  { %v1052_v40 = vmul.f32 %v1048_v28, %v906_v32  ;;  %v1066_v41 = vmul.f32 %v1062_v29, %v988_v33  ;;  %v3550_v32 = vld [vmem:[#allocation5 + $0x10] ss:$8 sps:$4 sm:$0xff]   ;;  %v3555_v33 = vld [vmem:[#allocation5 + $0x24] ss:$8 sps:$4 sm:$0xff]   ;;  %v3553_v34 = vld [vmem:[#allocation5 + $0x20] ss:$8 sps:$4 sm:$0xff]  }
 0x1c3   :  { %v1067_v42 = vadd.f32 %v1065_v37, %v1051_v36  ;;  %v3556_v36 = vld [vmem:[#allocation5 + $0x30] ss:$8 sps:$4 sm:$0xff]   ;;  %v3561_v37 = vld [vmem:[#allocation5 + $0x44] ss:$8 sps:$4 sm:$0xff]   ;;  %v3559_v38 = vld [vmem:[#allocation5 + $0x40] ss:$8 sps:$4 sm:$0xff]  }
 0x1c4   :  { %v1068_v43 = vadd.f32 %v1066_v41, %v1052_v40  ;;  %v3564_v39 = vld [vmem:[#allocation5 + $0x54] ss:$8 sps:$4 sm:$0xff]   ;;  %v3562_v40 = vld [vmem:[#allocation5 + $0x50] ss:$8 sps:$4 sm:$0xff]   ;;  %v3567_v41 = vld [vmem:[#allocation5 + $0x64] ss:$8 sps:$4 sm:$0xff]  }
 0x1c5   :  { %v1070_v44 = vrot.slane %v1067_v42, 7  ;;  %v3565_v42 = vld [vmem:[#allocation5 + $0x60] ss:$8 sps:$4 sm:$0xff]  }
 0x1c6   :  { %v1073_v45 = vrot.slane %v1068_v43, 6  ;;  %v3570_v43 = vld [vmem:[#allocation5 + $0x74] ss:$8 sps:$4 sm:$0xff]  }
 0x1c8   :  { %v1076_v46 = vsel %vm1075_vm1, %v1070_v44, %v1073_v45  ;;  %v3568_v44 = vld [vmem:[#allocation5 + $0x70] ss:$8 sps:$4 sm:$0xff]   ;;  %v3573_v45 = vld [vmem:[#allocation5 + $0x84] ss:$8 sps:$4 sm:$0xff]  }
 0x1c9   :  { %v1077_v16 = vpack.c.bf16 %v1076_v46, %v1076_v46  ;;  %v3571_v46 = vld [vmem:[#allocation5 + $0x80] ss:$8 sps:$4 sm:$0xff]  }
 0x1de   :  { %v3348_v47 = vpop.f32.mrb[4].mxu0 }
 0x1df   :  { %v3349_v48 = vpop.f32.mrb[5].mxu0 }
 0x1e0   :  { %v3350_v49 = vadd.f32 %v3349_v48, %v3348_v47  ;;  %v3351_v50 = vpop.f32.mrb[6].mxu0  ;;  %v3576_v47 = vld [vmem:[#allocation5 + $0x94] ss:$8 sps:$4 sm:$0xff]   ;;  %v3574_v48 = vld [vmem:[#allocation5 + $0x90] ss:$8 sps:$4 sm:$0xff]  }
 0x1e1   :  { %v3352_v51 = vpop.f32.mrb[7].mxu0  ;;  %v3577_v50 = vld [vmem:[#allocation5 + $0xa0] ss:$8 sps:$4 sm:$0xff]  }
 0x1e2   :  { %v1027_v58 = vadd.f32 %v3350_v49, %v285_v55  ;;  %v3579_v49 = vld [vmem:[#allocation5 + $0xa4] ss:$8 sps:$4 sm:$0xff]   ;;  %v3582_v51 = vld [vmem:[#allocation5 + $0xb4] ss:$8 sps:$4 sm:$0xff]  }
 0x1e3   :  { %v3588_v55 = vld [vmem:[#allocation5 + $0xd4] ss:$8 sps:$4 sm:$0xff]  }
 0x1e4   :  { %v1035_v4 = vmul.f32 %v1034_v59, %v1027_v58  ;;  %v3589_v58 = vld [vmem:[#allocation5 + $0xe0] ss:$8 sps:$4 sm:$0xff]   ;;  %v3594_v59 = vld [vmem:[#allocation5 + $0xf4] ss:$8 sps:$4 sm:$0xff]  }
 0x1fe   :  { %v944_v60 = vpop.f32.mrb[4].mxu1 }
 0x1ff   :  { %v945_v62 = vadd.f32 %v944_v60, %v269_v56  ;;  %v946_v63 = vpop.f32.mrb[5].mxu1  ;;  %v3586_v56 = vld [vmem:[#allocation5 + $0xd0] ss:$8 sps:$4 sm:$0xff]  }
 0x200   :  { %v947_v2 = vadd.f32 %v946_v63, %v273_v57  ;;  %v948_v3 = vpop.f32.mrb[6].mxu1  ;;  %v3591_v57 = vld [vmem:[#allocation5 + $0xe4] ss:$8 sps:$4 sm:$0xff]   ;;  %v3592_v60 = vld [vmem:[#allocation5 + $0xf0] ss:$8 sps:$4 sm:$0xff]  }
 0x201   :  { %v1033_v5 = vmul.f32 %v1032_v61, %v945_v62  ;;  %v949_v6 = vpop.f32.mrb[7].mxu1 }
 0x202   :  { %2965 = vst [vmem:[%s4320_s18 + $0x8] sm:$0xff] %v947_v2  ;;  %v1139_v17 = vpack.c.bf16 %v947_v2, %v3996_v8  ;;  %v1459_v6 = vld [vmem:[#allocation7] sm:$0xff] }
 0x203   :  { %v1036_v7 = vadd.f32 %v1035_v4, %v1033_v5 }
 0x205   :  { %v1078_v12 = vpack.c.bf16 %v1036_v7, %v4005_v9  ;;  %2963 = vst [vmem:[%s4319_s17 + $0x8] sm:$0xff] %v1036_v7  ;;  %v1463_v7 = vld [vmem:[#allocation7 + $0x20] sm:$0xff] }
 0x207   :  { %3359 = vmatpush3.bf16.xpose.msra.mxu1 %v1078_v12  ;;  %v1460_v12 = vld [vmem:[#allocation7 + $0x8] sm:$0xff] }
 0x208   :  { %3364 = vmatprep.subr.bf16.mxu1 %v3822_v10 }
 0x20e   :  { %3361 = vmatmul.mubr.bf16.vlgmr.msra.gmra.mrb[8].mxu1 %v1077_v16  ;;  %v3136_v16 = vcombine.low %v1459_v6, %v1463_v7 }
 0x20f   :  { %3365 = vmatpush3.bf16.msra.mxu1 %v1139_v17  ;;  %3366 = vmatprep.mubr.msk.bf16.mxu1 %vm3823_vm0, %v3822_v10  ;;  %v3549_v10 = vld [vmem:[#allocation5 + $0x4] ss:$8 sps:$4 sm:$0xff]   ;;  %v3137_v17 = vcombine.high %v1459_v6, %v1463_v7 }
 0x210   :  { %1381 = vmatprep.subr.bf16.mxu1 %v3549_v10  ;;  %v1480_v10 = vld [vmem:[#allocation7 + $0xa8] sm:$0xff] }
 0x211   :  { %2237 = vmatprep.subr.bf16.mxu0 %v3137_v17  ;;  %v1524_v17 = vld [vmem:[#allocation7 + $0x208] sm:$0xff] }
 0x212   :  { %2238 = vmatpush1.bf16.msra.mxu0 %v3136_v16  ;;  %v1527_v16 = vld [vmem:[#allocation7 + $0x220] sm:$0xff] }
 0x2e1   :  { %v1120_v9 = vpop.f32.mrb[8].mxu1 }
 0x2e2   :  { %v1121_v19 = vadd.f32 %v3102_v18, %v1120_v9  ;;  %v3362_v20 = vpop.f32.mrb[9].mxu1  ;;  %v1464_v18 = vld [vmem:[#allocation7 + $0x28] sm:$0xff]  ;;  %v1467_v9 = vld [vmem:[#allocation7 + $0x40] sm:$0xff] }
 0x2e3   :  { %v1123_v21 = vpop.f32.mrb[10].mxu1  ;;  %v3138_v20 = vcombine.low %v1460_v12, %v1464_v18 }
 0x2e4   :  { %v3363_v22 = vpop.f32.mrb[11].mxu1  ;;  %v1127_v23 = vsel %vm1126_vm2, %v1121_v19, -inf  ;;  %v3139_v21 = vcombine.high %v1460_v12, %v1464_v18  ;;  %v1523_v12 = vld [vmem:[#allocation7 + $0x200] sm:$0xff]  ;;  %v1528_v18 = vld [vmem:[#allocation7 + $0x228] sm:$0xff] }
 0x2e5   :  { %1128 = vmax.xlane.f32.xlu0 %v1127_v23  ;;  %v1468_v23 = vld [vmem:[#allocation7 + $0x48] sm:$0xff] }
 0x372   :  { %v1129_v24 = vpop.xlane.xlu0 %1128 }
 0x373   :  { %v1130_v25 = vsub.f32 %v1121_v19, %v1129_v24  ;;  %v1471_v19 = vld [vmem:[#allocation7 + $0x60] sm:$0xff]  ;;  %v1472_v24 = vld [vmem:[#allocation7 + $0x68] sm:$0xff] }
 0x374   :  { %v3145_v22 = vcombine.high %v1467_v9, %v1471_v19 }
 0x375   :  { %v1131_v8 = vmul.f32 1.442695, %v1130_v25  ;;  %v1475_v25 = vld [vmem:[#allocation7 + $0x80] sm:$0xff] }
 0x376   :  { %2239 = vmatprep.subr.bf16.mxu0 %v3145_v22  ;;  %v1531_v22 = vld [vmem:[#allocation7 + $0x240] sm:$0xff] }
 0x377   :  { %3693 = vpow2.f32 %v1131_v8  ;;  %v3147_v8 = vcombine.high %v1468_v23, %v1472_v24 }
 0x381   :  { %v3694_v26 = vpop.eup %3693 }
 0x382   :  { %v1133_v27 = vsel %vm1126_vm2, %v3694_v26, 0.0 }
 0x383   :  { %1134 = vadd.xlane.f32.xlu1 %v1133_v27  ;;  %v1476_v27 = vld [vmem:[#allocation7 + $0x88] sm:$0xff] }
 0x410   :  { %v1135_v28 = vpop.xlane.xlu1 %1134 }
 0x411   :  { %3695 = vrcp.f32 %v1135_v28  ;;  %v3144_v28 = vcombine.low %v1467_v9, %v1471_v19 }
 0x413   :  { %2240 = vmatpush1.bf16.msra.mxu0 %v3144_v28 }
 0x41b   :  { %v3696_v29 = vpop.eup %3695 }
 0x41c   :  { %v1137_v1 = vmul.f32 %v3696_v29, %v3694_v26  ;;  %v1479_v26 = vld [vmem:[#allocation7 + $0xa0] sm:$0xff]  ;;  %v3146_v29 = vcombine.low %v1468_v23, %v1472_v24  ;;  %v1532_v24 = vld [vmem:[#allocation7 + $0x248] sm:$0xff] }
 0x41d   :  { %v1535_v23 = vld [vmem:[#allocation7 + $0x260] sm:$0xff] }
 0x41e   :  { %v1138_v0 = vpack.c.bf16 %v1137_v1, %v1137_v1  ;;  %v3153_v1 = vcombine.high %v1475_v25, %v1479_v26  ;;  %v3208_v28 = vcombine.low %v1531_v22, %v1535_v23 }
 0x420   :  { %3367 = vmatmul.mubr.msk.bf16.vlgmr.msra.gmra.mrb[12].mxu1 %vm1140_vm3, %v1138_v0  ;;  %v1483_v0 = vld [vmem:[#allocation7 + $0xc0] sm:$0xff]  ;;  %2241 = vmatprep.subr.bf16.mxu0 %v3153_v1 }
 0x421   :  { %1382 = vmatpush1.bf16.msra.mxu1 %v3547_v30  ;;  %v3155_v30 = vcombine.high %v1476_v27, %v1480_v10 }
 0x422   :  { %1383 = vmatprep.subr.bf16.mxu1 %v3552_v31  ;;  %v1487_v31 = vld [vmem:[#allocation7 + $0xe0] sm:$0xff] }
 0x425   :  { %1384 = vmatpush1.bf16.msra.mxu1 %v3550_v32  ;;  %v1484_v32 = vld [vmem:[#allocation7 + $0xc8] sm:$0xff] }
 0x426   :  { %1385 = vmatprep.subr.bf16.mxu1 %v3555_v33  ;;  %v1488_v33 = vld [vmem:[#allocation7 + $0xe8] sm:$0xff] }
 0x429   :  { %1386 = vmatpush1.bf16.msra.mxu1 %v3553_v34  ;;  %v3152_v34 = vcombine.low %v1475_v25, %v1479_v26  ;;  %v1536_v25 = vld [vmem:[#allocation7 + $0x268] sm:$0xff]  ;;  %v3202_v26 = vcombine.low %v1524_v17, %v1528_v18 }
 0x42a   :  { %1387 = vmatprep.subr.bf16.mxu1 %v3558_v35  ;;  %v3154_v35 = vcombine.low %v1476_v27, %v1480_v10  ;;  %v3209_v27 = vcombine.high %v1531_v22, %v1535_v23  ;;  %v3211_v10 = vcombine.high %v1532_v24, %v1536_v25 }
 0x42b   :  { %2242 = vmatpush1.bf16.msra.mxu0 %v3152_v34 }
 0x42d   :  { %1388 = vmatpush1.bf16.msra.mxu1 %v3556_v36  ;;  %v3161_v36 = vcombine.high %v1483_v0, %v1487_v31 }
 0x42e   :  { %1389 = vmatprep.subr.bf16.mxu1 %v3561_v37  ;;  %v3163_v37 = vcombine.high %v1484_v32, %v1488_v33 }
 0x42f   :  { %2243 = vmatprep.subr.bf16.mxu0 %v3161_v36  ;;  %v3718_v36 = vld [vmem:[%s4325_s23 + $0x8] sm:$0xff] }
 0x431   :  { %1390 = vmatpush1.bf16.msra.mxu1 %v3559_v38  ;;  %v1491_v38 = vld [vmem:[#allocation7 + $0x100] sm:$0xff] }
 0x432   :  { %1391 = vmatprep.subr.bf16.mxu1 %v3564_v39  ;;  %v1495_v39 = vld [vmem:[#allocation7 + $0x120] sm:$0xff] }
 0x435   :  { %1392 = vmatpush1.bf16.msra.mxu1 %v3562_v40  ;;  %v1492_v40 = vld [vmem:[#allocation7 + $0x108] sm:$0xff] }
 0x436   :  { %1393 = vmatprep.subr.bf16.mxu1 %v3567_v41  ;;  %v1496_v41 = vld [vmem:[#allocation7 + $0x128] sm:$0xff] }
 0x439   :  { %1394 = vmatpush1.bf16.msra.mxu1 %v3565_v42  ;;  %v3160_v42 = vcombine.low %v1483_v0, %v1487_v31 }
 0x43a   :  { %1395 = vmatprep.subr.bf16.mxu1 %v3570_v43  ;;  %v3162_v43 = vcombine.low %v1484_v32, %v1488_v33  ;;  %v3717_v33 = vld [vmem:[%s4325_s23] sm:$0xff] }
 0x43b   :  { %2244 = vmatpush1.bf16.msra.mxu0 %v3160_v42 }
 0x43d   :  { %1396 = vmatpush1.bf16.msra.mxu1 %v3568_v44  ;;  %v3169_v44 = vcombine.high %v1491_v38, %v1495_v39 }
 0x43e   :  { %1397 = vmatprep.subr.bf16.mxu1 %v3573_v45  ;;  %v3171_v45 = vcombine.high %v1492_v40, %v1496_v41 }
 0x43f   :  { %2245 = vmatprep.subr.bf16.mxu0 %v3169_v44  ;;  %v1543_v44 = vld [vmem:[#allocation7 + $0x2a0] sm:$0xff] }
 0x441   :  { %1398 = vmatpush1.bf16.msra.mxu1 %v3571_v46  ;;  %v1499_v46 = vld [vmem:[#allocation7 + $0x140] sm:$0xff] }
 0x442   :  { %1399 = vmatprep.subr.bf16.mxu1 %v3576_v47  ;;  %v1503_v47 = vld [vmem:[#allocation7 + $0x160] sm:$0xff] }
 0x445   :  { %1400 = vmatpush1.bf16.msra.mxu1 %v3574_v48  ;;  %v1500_v48 = vld [vmem:[#allocation7 + $0x148] sm:$0xff] }
 0x446   :  { %1401 = vmatprep.subr.bf16.mxu1 %v3579_v49  ;;  %v1504_v49 = vld [vmem:[#allocation7 + $0x168] sm:$0xff] }
 0x449   :  { %1402 = vmatpush1.bf16.msra.mxu1 %v3577_v50  ;;  %v3168_v50 = vcombine.low %v1491_v38, %v1495_v39 }
 0x44a   :  { %1403 = vmatprep.subr.bf16.mxu1 %v3582_v51  ;;  %v3170_v51 = vcombine.low %v1492_v40, %v1496_v41 }
 0x44b   :  { %2246 = vmatpush1.bf16.msra.mxu0 %v3168_v50 }
 0x44d   :  { %1404 = vmatpush1.bf16.msra.mxu1 %v3580_v52  ;;  %v3177_v52 = vcombine.high %v1499_v46, %v1503_v47 }
 0x44e   :  { %1405 = vmatprep.subr.bf16.mxu1 %v3585_v53  ;;  %v3179_v53 = vcombine.high %v1500_v48, %v1504_v49 }
 0x44f   :  { %2247 = vmatprep.subr.bf16.mxu0 %v3177_v52  ;;  %v1551_v52 = vld [vmem:[#allocation7 + $0x2e0] sm:$0xff] }
 0x451   :  { %1406 = vmatpush1.bf16.msra.mxu1 %v3583_v54  ;;  %v1507_v54 = vld [vmem:[#allocation7 + $0x180] sm:$0xff] }
 0x452   :  { %1407 = vmatprep.subr.bf16.mxu1 %v3588_v55  ;;  %v1511_v55 = vld [vmem:[#allocation7 + $0x1a0] sm:$0xff] }
 0x455   :  { %1408 = vmatpush1.bf16.msra.mxu1 %v3586_v56  ;;  %v1508_v56 = vld [vmem:[#allocation7 + $0x188] sm:$0xff] }
 0x456   :  { %1409 = vmatprep.subr.bf16.mxu1 %v3591_v57  ;;  %v1512_v57 = vld [vmem:[#allocation7 + $0x1a8] sm:$0xff] }
 0x459   :  { %1410 = vmatpush1.bf16.msra.mxu1 %v3589_v58  ;;  %v3176_v58 = vcombine.low %v1499_v46, %v1503_v47  ;;  %v1544_v47 = vld [vmem:[#allocation7 + $0x2a8] sm:$0xff] }
 0x45a   :  { %1411 = vmatprep.subr.bf16.mxu1 %v3594_v59  ;;  %v3178_v59 = vcombine.low %v1500_v48, %v1504_v49 }
 0x45b   :  { %2248 = vmatpush1.bf16.msra.mxu0 %v3176_v58 }
 0x45d   :  { %1412 = vmatpush1.bf16.msra.mxu1 %v3592_v60  ;;  %v3185_v60 = vcombine.high %v1507_v54, %v1511_v55 }
 0x45e   :  { %2278 = vmatprep.subr.bf16.mxu1 %v3139_v21  ;;  %v3203_v21 = vcombine.high %v1524_v17, %v1528_v18  ;;  %v1571_v18 = vld [vmem:[#allocation7 + $0x380] sm:$0xff] }
 0x45f   :  { %2249 = vmatprep.subr.bf16.mxu0 %v3185_v60  ;;  %v1559_v60 = vld [vmem:[#allocation7 + $0x320] sm:$0xff] }
 0x4f3   :  { %v1178_v61 = vpop.f32.mrb[12].mxu1 }
 0x4f4   :  { %v1185_v62 = vrot.slane %v1178_v61, 1  ;;  %v3368_v63 = vpop.f32.mrb[13].mxu1  ;;  %v1187_v5 = vpack.c.bf16 %v1178_v61, %v1178_v61  ;;  %v3187_v61 = vcombine.high %v1508_v56, %v1512_v57 }
 0x4f5   :  { %v1181_v2 = vpop.f32.mrb[14].mxu1  ;;  %v1519_v63 = vld [vmem:[#allocation7 + $0x1e0] sm:$0xff] }
 0x4f6   :  { %v1188_v3 = vpack.c.bf16 %v1185_v62, %v1185_v62  ;;  %v3369_v4 = vpop.f32.mrb[15].mxu1  ;;  %v1515_v62 = vld [vmem:[#allocation7 + $0x1c0] sm:$0xff]  ;;  %v1516_v2 = vld [vmem:[#allocation7 + $0x1c8] sm:$0xff] }
 0x4f7   :  { %v3184_v4 = vcombine.low %v1507_v54, %v1511_v55  ;;  %v3193_v6 = vcombine.high %v1515_v62, %v1519_v63  ;;  %v3192_v9 = vcombine.low %v1515_v62, %v1519_v63  ;;  %v1552_v55 = vld [vmem:[#allocation7 + $0x2e8] sm:$0xff] }
 0x4f8   :  { %1413 = vmatprep.mubr.bf16.mxu1 %v1188_v3  ;;  %v1520_v3 = vld [vmem:[#allocation7 + $0x1e8] sm:$0xff] }
 0x4f9   :  { %1414 = vmatmul.mubr.bf16.vlgmr.msra.gmra.mrb[16].mxu1 %v1187_v5  ;;  %v3186_v5 = vcombine.low %v1508_v56, %v1512_v57  ;;  %v3195_v7 = vcombine.high %v1516_v2, %v1520_v3  ;;  %2250 = vmatpush1.bf16.msra.mxu0 %v3184_v4  ;;  %v3194_v19 = vcombine.low %v1516_v2, %v1520_v3  ;;  %v1560_v63 = vld [vmem:[#allocation7 + $0x328] sm:$0xff]  ;;  %v1563_v2 = vld [vmem:[#allocation7 + $0x340] sm:$0xff] }
 0x4fa   :  { %2279 = vmatpush1.bf16.msra.mxu1 %v3138_v20  ;;  %2251 = vmatprep.subr.bf16.mxu0 %v3193_v6  ;;  %v3201_v20 = vcombine.high %v1523_v12, %v1527_v16  ;;  %v1567_v3 = vld [vmem:[#allocation7 + $0x360] sm:$0xff]  ;;  %v1564_v6 = vld [vmem:[#allocation7 + $0x348] sm:$0xff] }
 0x4fb   :  { %2280 = vmatprep.subr.bf16.mxu1 %v3147_v8  ;;  %v3200_v8 = vcombine.low %v1523_v12, %v1527_v16  ;;  %v3241_v16 = vcombine.high %v1563_v2, %v1567_v3 }
 0x4fd   :  { %2252 = vmatpush1.bf16.msra.mxu0 %v3192_v9  ;;  %v1575_v9 = vld [vmem:[#allocation7 + $0x3a0] sm:$0xff] }
 0x4fe   :  { %2281 = vmatpush1.bf16.msra.mxu1 %v3146_v29  ;;  %2253 = vmatprep.subr.bf16.mxu0 %v3201_v20  ;;  %v3210_v29 = vcombine.low %v1532_v24, %v1536_v25  ;;  %v1576_v20 = vld [vmem:[#allocation7 + $0x3a8] sm:$0xff]  ;;  %v3249_v23 = vcombine.high %v1571_v18, %v1575_v9  ;;  %v1579_v25 = vld [vmem:[#allocation7 + $0x3c0] sm:$0xff] }
 0x4ff   :  { %2282 = vmatprep.subr.bf16.mxu1 %v3155_v30 }
 0x501   :  { %2254 = vmatpush1.bf16.msra.mxu0 %v3200_v8  ;;  %v1583_v8 = vld [vmem:[#allocation7 + $0x3e0] sm:$0xff] }
 0x502   :  { %2283 = vmatpush1.bf16.msra.mxu1 %v3154_v35  ;;  %2255 = vmatprep.subr.bf16.mxu0 %v3209_v27  ;;  %v1584_v27 = vld [vmem:[#allocation7 + $0x3e8] sm:$0xff] }
 0x503   :  { %2284 = vmatprep.subr.bf16.mxu1 %v3163_v37 }
 0x505   :  { %2256 = vmatpush1.bf16.msra.mxu0 %v3208_v28 }
 0x506   :  { %2285 = vmatpush1.bf16.msra.mxu1 %v3162_v43  ;;  %v1539_v43 = vld [vmem:[#allocation7 + $0x280] sm:$0xff] }
 0x507   :  { %2286 = vmatprep.subr.bf16.mxu1 %v3171_v45  ;;  %v1540_v45 = vld [vmem:[#allocation7 + $0x288] sm:$0xff]  ;;  %v3217_v46 = vcombine.high %v1539_v43, %v1543_v44  ;;  %v3216_v48 = vcombine.low %v1539_v43, %v1543_v44  ;;  %v1430_v44 = vld [vmem:[%s4314_s12] sm:$0x3] }
 0x508   :  { %v3218_v49 = vcombine.low %v1540_v45, %v1544_v47  ;;  %v3219_v50 = vcombine.high %v1540_v45, %v1544_v47  ;;  %v1452_v45 = vrot.slane %v1430_v44, %v3975_v14 }
 0x509   :  { %2257 = vmatprep.subr.bf16.mxu0 %v3217_v46  ;;  %v1448_v46 = vrot.slane %v1430_v44, %v3978_v15 }
 0x50a   :  { %2287 = vmatpush1.bf16.msra.mxu1 %v3170_v51  ;;  %2258 = vmatpush1.bf16.msra.mxu0 %v3216_v48  ;;  %v1547_v51 = vld [vmem:[#allocation7 + $0x2c0] sm:$0xff] }
 0x50b   :  { %2288 = vmatprep.subr.bf16.mxu1 %v3179_v53  ;;  %v1548_v53 = vld [vmem:[#allocation7 + $0x2c8] sm:$0xff]  ;;  %v3225_v54 = vcombine.high %v1547_v51, %v1551_v52  ;;  %v3224_v56 = vcombine.low %v1547_v51, %v1551_v52 }
 0x50c   :  { %v3226_v57 = vcombine.low %v1548_v53, %v1552_v55  ;;  %v3227_v58 = vcombine.high %v1548_v53, %v1552_v55 }
 0x50d   :  { %2259 = vmatprep.subr.bf16.mxu0 %v3225_v54 }
 0x50e   :  { %2289 = vmatpush1.bf16.msra.mxu1 %v3178_v59  ;;  %v1555_v59 = vld [vmem:[#allocation7 + $0x300] sm:$0xff]  ;;  %2260 = vmatpush1.bf16.msra.mxu0 %v3224_v56  ;;  %v1469_v56 = vld [vmem:[#allocation7 + $0x50] sm:$0xff] }
 0x50f   :  { %2290 = vmatprep.subr.bf16.mxu1 %v3187_v61  ;;  %v1556_v61 = vld [vmem:[#allocation7 + $0x308] sm:$0xff]  ;;  %v3233_v62 = vcombine.high %v1555_v59, %v1559_v60  ;;  %v3232_v4 = vcombine.low %v1555_v59, %v1559_v60  ;;  %v1474_v59 = vld [vmem:[#allocation7 + $0x78] sm:$0xff] }
 0x510   :  { %v3234_v12 = vcombine.low %v1556_v61, %v1560_v63 }
 0x511   :  { %2261 = vmatprep.subr.bf16.mxu0 %v3233_v62  ;;  %v1477_v62 = vld [vmem:[#allocation7 + $0x90] sm:$0xff] }
 0x512   :  { %2291 = vmatpush1.bf16.msra.mxu1 %v3186_v5  ;;  %v3235_v5 = vcombine.high %v1556_v61, %v1560_v63  ;;  %2262 = vmatpush1.bf16.msra.mxu0 %v3232_v4  ;;  %v1478_v4 = vld [vmem:[#allocation7 + $0x98] sm:$0xff] }
 0x513   :  { %2292 = vmatprep.subr.bf16.mxu1 %v3195_v7  ;;  %v1568_v7 = vld [vmem:[#allocation7 + $0x368] sm:$0xff]  ;;  %2263 = vmatprep.subr.bf16.mxu0 %v3241_v16 }
 0x514   :  { %v3243_v17 = vcombine.high %v1564_v6, %v1568_v7  ;;  %v3242_v22 = vcombine.low %v1564_v6, %v1568_v7 }
 0x516   :  { %2293 = vmatpush1.bf16.msra.mxu1 %v3194_v19  ;;  %v1572_v19 = vld [vmem:[#allocation7 + $0x388] sm:$0xff] }
 0x517   :  { %2294 = vmatprep.subr.bf16.mxu1 %v3203_v21  ;;  %v3240_v21 = vcombine.low %v1563_v2, %v1567_v3  ;;  %v3251_v24 = vcombine.high %v1572_v19, %v1576_v20  ;;  %v3250_v28 = vcombine.low %v1572_v19, %v1576_v20  ;;  %v1481_v3 = vld [vmem:[#allocation7 + $0xb0] sm:$0xff]  ;;  %v1490_v19 = vld [vmem:[#allocation7 + $0xf8] sm:$0xff] }
 0x518   :  { %v3156_v20 = vcombine.low %v1477_v62, %v1481_v3 }
 0x519   :  { %2264 = vmatpush1.bf16.msra.mxu0 %v3240_v21 }
 0x51a   :  { %2295 = vmatpush1.bf16.msra.mxu1 %v3202_v26  ;;  %v1580_v26 = vld [vmem:[#allocation7 + $0x3c8] sm:$0xff]  ;;  %2265 = vmatprep.subr.bf16.mxu0 %v3249_v23 }
 0x51b   :  { %2296 = vmatprep.subr.bf16.mxu1 %v3211_v10  ;;  %v3248_v10 = vcombine.low %v1571_v18, %v1575_v9  ;;  %v1489_v18 = vld [vmem:[#allocation7 + $0xf0] sm:$0xff]  ;;  %v1486_v9 = vld [vmem:[#allocation7 + $0xd8] sm:$0xff] }
 0x51c   :  { %v3167_v23 = vcombine.high %v1486_v9, %v1490_v19 }
 0x51d   :  { %2266 = vmatpush1.bf16.msra.mxu0 %v3248_v10  ;;  %v3166_v10 = vcombine.low %v1486_v9, %v1490_v19  ;;  %v1546_v9 = vld [vmem:[#allocation7 + $0x2b8] sm:$0xff] }
 0x51e   :  { %2297 = vmatpush1.bf16.msra.mxu1 %v3210_v29  ;;  %v3257_v29 = vcombine.high %v1579_v25, %v1583_v8 }
 0x51f   :  { %2298 = vmatprep.subr.bf16.mxu1 %v3219_v50 }
 0x520   :  { %2267 = vmatprep.subr.bf16.mxu0 %v3257_v29 }
 0x522   :  { %2299 = vmatpush1.bf16.msra.mxu1 %v3218_v49 }
 0x523   :  { %2300 = vmatprep.subr.bf16.mxu1 %v3227_v58  ;;  %v1470_v58 = vld [vmem:[#allocation7 + $0x58] sm:$0xff] }
 0x524   :  { %v3151_v2 = vcombine.high %v1470_v58, %v1474_v59  ;;  %v3150_v7 = vcombine.low %v1470_v58, %v1474_v59 }
 0x526   :  { %2301 = vmatpush1.bf16.msra.mxu1 %v3226_v57  ;;  %v1473_v57 = vld [vmem:[#allocation7 + $0x70] sm:$0xff] }
 0x527   :  { %2302 = vmatprep.subr.bf16.mxu1 %v3235_v5  ;;  %v3149_v63 = vcombine.high %v1469_v56, %v1473_v57  ;;  %v1482_v5 = vld [vmem:[#allocation7 + $0xb8] sm:$0xff]  ;;  %v3148_v6 = vcombine.low %v1469_v56, %v1473_v57 }
 0x528   :  { %v3159_v16 = vcombine.high %v1478_v4, %v1482_v5  ;;  %v3158_v21 = vcombine.low %v1478_v4, %v1482_v5  ;;  %v1526_v56 = vld [vmem:[#allocation7 + $0x218] sm:$0xff] }
 0x529   :  { %v1530_v57 = vld [vmem:[#allocation7 + $0x238] sm:$0xff] }
 0x52a   :  { %2303 = vmatpush1.bf16.msra.mxu1 %v3234_v12  ;;  %v3157_v12 = vcombine.high %v1477_v62, %v1481_v3  ;;  %v3207_v62 = vcombine.high %v1526_v56, %v1530_v57  ;;  %v1534_v3 = vld [vmem:[#allocation7 + $0x258] sm:$0xff] }
 0x52b   :  { %2304 = vmatprep.subr.bf16.mxu1 %v3243_v17  ;;  %v1485_v17 = vld [vmem:[#allocation7 + $0xd0] sm:$0xff]  ;;  %v1538_v4 = vld [vmem:[#allocation7 + $0x278] sm:$0xff] }
 0x52e   :  { %2305 = vmatpush1.bf16.msra.mxu1 %v3242_v22  ;;  %v3165_v22 = vcombine.high %v1485_v17, %v1489_v18 }
 0x52f   :  { %2306 = vmatprep.subr.bf16.mxu1 %v3251_v24  ;;  %v1493_v24 = vld [vmem:[#allocation7 + $0x110] sm:$0xff] }
 0x532   :  { %2307 = vmatpush1.bf16.msra.mxu1 %v3250_v28 }
 0x5cc   :  { %v1415_v1 = vpop.f32.mrb[16].mxu1 }
 0x5cd   :  { %v1424_v30 = vrot.slane %v1415_v1, 1  ;;  %v1417_v0 = vpop.f32.mrb[17].mxu1  ;;  %v3259_v1 = vcombine.high %v1580_v26, %v1584_v27 }
 0x5ce   :  { %v1425_v31 = vrot.slane %v1417_v0, 1  ;;  %v1419_v32 = vpop.f32.mrb[18].mxu1  ;;  %v3258_v0 = vcombine.low %v1580_v26, %v1584_v27  ;;  %v1498_v26 = vld [vmem:[#allocation7 + $0x138] sm:$0xff]  ;;  %v3164_v27 = vcombine.low %v1485_v17, %v1489_v18  ;;  %v1545_v17 = vld [vmem:[#allocation7 + $0x2b0] sm:$0xff] }
 0x5cf   :  { %v4057_v34 = vadd.f32 %v3717_v33, %v1424_v30  ;;  %v1420_v35 = vpop.f32.mrb[19].mxu1  ;;  %v3256_v30 = vcombine.low %v1579_v25, %v1583_v8  ;;  %2308 = vmatprep.subr.bf16.mxu1 %v3259_v1  ;;  %v1465_v32 = vld [vmem:[#allocation7 + $0x30] sm:$0xff]  ;;  %v1462_v33 = vld [vmem:[#allocation7 + $0x18] sm:$0xff] }
 0x5d0   :  { %v4062_v37 = vadd.f32 %v3718_v36, %v1425_v31  ;;  %v1461_v31 = vld [vmem:[#allocation7 + $0x10] sm:$0xff]  ;;  %2309 = vmatpush1.bf16.msra.mxu1 %v3258_v0  ;;  %v1466_v36 = vld [vmem:[#allocation7 + $0x38] sm:$0xff] }
 0x5d1   :  { %v1431_v38 = vmul.f32 %v4057_v34, %v4057_v34  ;;  %2268 = vmatpush1.bf16.msra.mxu0 %v3256_v30  ;;  %v3141_v35 = vcombine.high %v1461_v31, %v1465_v32  ;;  %v1497_v25 = vld [vmem:[#allocation7 + $0x130] sm:$0xff]  ;;  %v1494_v8 = vld [vmem:[#allocation7 + $0x118] sm:$0xff] }
 0x5d2   :  { %v1432_v39 = vmul.f32 %v4062_v37, %v4062_v37  ;;  %v3173_v28 = vcombine.high %v1493_v24, %v1497_v25  ;;  %v3175_v29 = vcombine.high %v1494_v8, %v1498_v26  ;;  %v1501_v1 = vld [vmem:[#allocation7 + $0x150] sm:$0xff]  ;;  %v1502_v0 = vld [vmem:[#allocation7 + $0x158] sm:$0xff] }
 0x5d3   :  { %v1434_v40 = vsel %vm1433_vm4, %v1431_v38, 0.0  ;;  %v3140_v38 = vcombine.low %v1461_v31, %v1465_v32  ;;  %2319 = vmatprep.subr.bf16.mxu0 %v3141_v35  ;;  %v1505_v30 = vld [vmem:[#allocation7 + $0x170] sm:$0xff]  ;;  %v1506_v31 = vld [vmem:[#allocation7 + $0x178] sm:$0xff]  ;;  %v3172_v32 = vcombine.low %v1493_v24, %v1497_v25 }
 0x5d4   :  { %v1435_v41 = vsel %vm1433_vm4, %v1432_v39, 0.0  ;;  %v3142_v39 = vcombine.low %v1462_v33, %v1466_v36  ;;  %v3181_v35 = vcombine.high %v1501_v1, %v1505_v30  ;;  %v1542_v18 = vld [vmem:[#allocation7 + $0x298] sm:$0xff]  ;;  %v1553_v24 = vld [vmem:[#allocation7 + $0x2f0] sm:$0xff] }
 0x5d5   :  { %v1436_v42 = vadd.f32 %v1435_v41, %v1434_v40  ;;  %v3143_v40 = vcombine.high %v1462_v33, %v1466_v36  ;;  %v3174_v33 = vcombine.low %v1494_v8, %v1498_v26  ;;  %v3183_v36 = vcombine.high %v1502_v0, %v1506_v31  ;;  %v1550_v25 = vld [vmem:[#allocation7 + $0x2d8] sm:$0xff] }
 0x5d6   :  { %v1554_v8 = vld [vmem:[#allocation7 + $0x2f8] sm:$0xff] }
 0x5d7   :  { %1437 = vadd.xlane.f32.xlu1 %v1436_v42  ;;  %2360 = vmatprep.subr.bf16.mxu1 %v3143_v40  ;;  %v1510_v40 = vld [vmem:[#allocation7 + $0x198] sm:$0xff] }
 0x664   :  { %v1438_v41 = vpop.xlane.xlu1 %1437 }
 0x665   :  { %v1439_v42 = vmul.f32 0.00390625, %v1438_v41  ;;  %v1514_v41 = vld [vmem:[#allocation7 + $0x1b8] sm:$0xff] }
 0x667   :  { %v1440_v43 = vadd.f32 1e-05, %v1439_v42  ;;  %v3180_v42 = vcombine.low %v1501_v1, %v1505_v30  ;;  %v1561_v1 = vld [vmem:[#allocation7 + $0x330] sm:$0xff]  ;;  %v1558_v30 = vld [vmem:[#allocation7 + $0x318] sm:$0xff] }
 0x669   :  { %3697 = vrsqrt.f32 %v1440_v43  ;;  %v3182_v43 = vcombine.low %v1502_v0, %v1506_v31  ;;  %v1562_v0 = vld [vmem:[#allocation7 + $0x338] sm:$0xff] }
 0x673   :  { %v3698_v47 = vpop.eup %3697 }
 0x674   :  { %v1443_v48 = vmul.f32 %v3698_v47, %v4062_v37  ;;  %v1442_v49 = vmul.f32 %v3698_v47, %v4057_v34  ;;  %v1521_v47 = vld [vmem:[#allocation7 + $0x1f0] sm:$0xff] }
 0x676   :  { %v1456_v50 = vmul.f32 %v1452_v45, %v1443_v48  ;;  %v1455_v51 = vmul.f32 %v1448_v46, %v1442_v49  ;;  %v3191_v45 = vcombine.high %v1510_v40, %v1514_v41  ;;  %v1517_v46 = vld [vmem:[#allocation7 + $0x1d0] sm:$0xff]  ;;  %v1518_v48 = vld [vmem:[#allocation7 + $0x1d8] sm:$0xff] }
 0x677   :  { %v1522_v49 = vld [vmem:[#allocation7 + $0x1f8] sm:$0xff]  ;;  %v3196_v58 = vcombine.low %v1517_v46, %v1521_v47 }
 0x678   :  { %v1458_v52 = vpack.c.bf16 %v1456_v50, %v1456_v50  ;;  %v1457_v53 = vpack.c.bf16 %v1455_v51, %v1455_v51  ;;  %v3190_v51 = vcombine.low %v1510_v40, %v1514_v41  ;;  %v3198_v59 = vcombine.low %v1518_v48, %v1522_v49  ;;  %v1570_v40 = vld [vmem:[#allocation7 + $0x378] sm:$0xff] }
 0x67a   :  { %v1592_v54 = vshrl.u32 %v1458_v52, 16  ;;  %v1588_v55 = vshrl.u32 %v1457_v53, 16  ;;  %v3197_v52 = vcombine.high %v1517_v46, %v1521_v47  ;;  %v3199_v53 = vcombine.high %v1518_v48, %v1522_v49  ;;  %v1577_v46 = vld [vmem:[#allocation7 + $0x3b0] sm:$0xff]  ;;  %v1574_v47 = vld [vmem:[#allocation7 + $0x398] sm:$0xff] }
 0x67b   :  { %v1578_v48 = vld [vmem:[#allocation7 + $0x3b8] sm:$0xff] }
 0x67c   :  { %v1594_v60 = vrot.slane %v1592_v54, 3  ;;  %v4077_v61 = vrot.slane %v1588_v55, 3  ;;  %v1525_v54 = vld [vmem:[#allocation7 + $0x210] sm:$0xff] }
 0x67d   :  { %v1529_v55 = vld [vmem:[#allocation7 + $0x230] sm:$0xff] }
 0x67e   :  { %2269 = vmatprep.mubr.bf16.mxu0 %v1594_v60  ;;  %2310 = vmatprep.mubr.bf16.mxu1 %v1594_v60  ;;  %v3204_v5 = vcombine.low %v1525_v54, %v1529_v55 }
 0x67f   :  { %2270 = vmatmul.mubr.bf16.vlgmr.msra.gmra.mrb[8].mxu0 %v4077_v61  ;;  %2311 = vmatmul.mubr.bf16.vlgmr.msra.gmra.mrb[20].mxu1 %v4077_v61 }
 0x680   :  { %2320 = vmatpush1.bf16.msra.mxu0 %v3140_v38  ;;  %2361 = vmatpush1.bf16.msra.mxu1 %v3142_v39  ;;  %v1509_v38 = vld [vmem:[#allocation7 + $0x190] sm:$0xff] }
 0x681   :  { %2351 = vmatprep.mubr.bf16.mxu0 %v1594_v60  ;;  %2392 = vmatprep.mubr.bf16.mxu1 %v1594_v60  ;;  %v1513_v39 = vld [vmem:[#allocation7 + $0x1b0] sm:$0xff]  ;;  %v3205_v60 = vcombine.high %v1525_v54, %v1529_v55  ;;  %v1582_v55 = vld [vmem:[#allocation7 + $0x3d8] sm:$0xff] }
 0x682   :  { %2321 = vmatprep.subr.bf16.mxu0 %v3149_v63  ;;  %2362 = vmatprep.subr.bf16.mxu1 %v3151_v2  ;;  %v3189_v44 = vcombine.high %v1509_v38, %v1513_v39  ;;  %v3188_v50 = vcombine.low %v1509_v38, %v1513_v39  ;;  %v1533_v63 = vld [vmem:[#allocation7 + $0x250] sm:$0xff]  ;;  %v1566_v39 = vld [vmem:[#allocation7 + $0x358] sm:$0xff] }
 0x683   :  { %v1537_v2 = vld [vmem:[#allocation7 + $0x270] sm:$0xff] }
 0x684   :  { %2322 = vmatpush1.bf16.msra.mxu0 %v3148_v6  ;;  %2363 = vmatpush1.bf16.msra.mxu1 %v3150_v7  ;;  %v3206_v6 = vcombine.low %v1526_v56, %v1530_v57  ;;  %v3213_v7 = vcombine.high %v1533_v63, %v1537_v2  ;;  %v3212_v19 = vcombine.low %v1533_v63, %v1537_v2  ;;  %v1569_v38 = vld [vmem:[#allocation7 + $0x370] sm:$0xff]  ;;  %v1586_v56 = vld [vmem:[#allocation7 + $0x3f8] sm:$0xff]  ;;  %v3597_v2 = vld [vmem:[%s4316_s14 + $0x4] ss:$8 sps:$4 sm:$0xff]  }
 0x685   :  { %2323 = vmatprep.subr.bf16.mxu0 %v3157_v12  ;;  %2364 = vmatprep.subr.bf16.mxu1 %v3159_v16  ;;  %v3215_v12 = vcombine.high %v1534_v3, %v1538_v4  ;;  %v1541_v16 = vld [vmem:[#allocation7 + $0x290] sm:$0xff]  ;;  %v3262_v63 = vcombine.low %v1582_v55, %v1586_v56 }
 0x686   :  { %v3220_v26 = vcombine.low %v1541_v16, %v1545_v17  ;;  %v1585_v54 = vld [vmem:[#allocation7 + $0x3f0] sm:$0xff] }
 0x688   :  { %2324 = vmatpush1.bf16.msra.mxu0 %v3156_v20  ;;  %2365 = vmatpush1.bf16.msra.mxu1 %v3158_v21  ;;  %v3214_v20 = vcombine.low %v1534_v3, %v1538_v4  ;;  %v3221_v21 = vcombine.high %v1541_v16, %v1545_v17  ;;  %v3595_v3 = vld [vmem:[%s4316_s14] ss:$8 sps:$4 sm:$0xff]   ;;  %v3600_v4 = vld [vmem:[%s4316_s14 + $0x14] ss:$8 sps:$4 sm:$0xff]   ;;  %v3609_v16 = vld [vmem:[%s4316_s14 + $0x44] ss:$8 sps:$4 sm:$0xff]  }
 0x689   :  { %2325 = vmatprep.subr.bf16.mxu0 %v3165_v22  ;;  %2366 = vmatprep.subr.bf16.mxu1 %v3167_v23  ;;  %v3223_v22 = vcombine.high %v1542_v18, %v1546_v9  ;;  %v1549_v23 = vld [vmem:[#allocation7 + $0x2d0] sm:$0xff]  ;;  %v3607_v17 = vld [vmem:[%s4316_s14 + $0x40] ss:$8 sps:$4 sm:$0xff]  }
 0x68a   :  { %v3228_v31 = vcombine.low %v1549_v23, %v1553_v24 }
 0x68c   :  { %2326 = vmatpush1.bf16.msra.mxu0 %v3164_v27  ;;  %2367 = vmatpush1.bf16.msra.mxu1 %v3166_v10  ;;  %v3222_v27 = vcombine.low %v1542_v18, %v1546_v9  ;;  %v3229_v10 = vcombine.high %v1549_v23, %v1553_v24  ;;  %v3612_v18 = vld [vmem:[%s4316_s14 + $0x54] ss:$8 sps:$4 sm:$0xff]   ;;  %v3610_v9 = vld [vmem:[%s4316_s14 + $0x50] ss:$8 sps:$4 sm:$0xff]   ;;  %v3621_v23 = vld [vmem:[%s4316_s14 + $0x84] ss:$8 sps:$4 sm:$0xff]  }
 0x68d   :  { %2327 = vmatprep.subr.bf16.mxu0 %v3173_v28  ;;  %2368 = vmatprep.subr.bf16.mxu1 %v3175_v29  ;;  %v3231_v28 = vcombine.high %v1550_v25, %v1554_v8  ;;  %v1557_v29 = vld [vmem:[#allocation7 + $0x310] sm:$0xff]  ;;  %v3619_v24 = vld [vmem:[%s4316_s14 + $0x80] ss:$8 sps:$4 sm:$0xff]  }
 0x68e   :  { %v3236_v41 = vcombine.low %v1557_v29, %v1561_v1 }
 0x690   :  { %2328 = vmatpush1.bf16.msra.mxu0 %v3172_v32  ;;  %2369 = vmatpush1.bf16.msra.mxu1 %v3174_v33  ;;  %v3230_v32 = vcombine.low %v1550_v25, %v1554_v8  ;;  %v3237_v33 = vcombine.high %v1557_v29, %v1561_v1  ;;  %v3624_v25 = vld [vmem:[%s4316_s14 + $0x94] ss:$8 sps:$4 sm:$0xff]   ;;  %v3622_v8 = vld [vmem:[%s4316_s14 + $0x90] ss:$8 sps:$4 sm:$0xff]   ;;  %v3633_v29 = vld [vmem:[%s4316_s14 + $0xc4] ss:$8 sps:$4 sm:$0xff]  }
 0x691   :  { %2329 = vmatprep.subr.bf16.mxu0 %v3181_v35  ;;  %2370 = vmatprep.subr.bf16.mxu1 %v3183_v36  ;;  %v3239_v35 = vcombine.high %v1558_v30, %v1562_v0  ;;  %v1565_v36 = vld [vmem:[#allocation7 + $0x350] sm:$0xff]  ;;  %v3631_v1 = vld [vmem:[%s4316_s14 + $0xc0] ss:$8 sps:$4 sm:$0xff]  }
 0x692   :  { %v3244_v49 = vcombine.low %v1565_v36, %v1569_v38 }
 0x694   :  { %2330 = vmatpush1.bf16.msra.mxu0 %v3180_v42  ;;  %2371 = vmatpush1.bf16.msra.mxu1 %v3182_v43  ;;  %v3238_v42 = vcombine.low %v1558_v30, %v1562_v0  ;;  %v3245_v43 = vcombine.high %v1565_v36, %v1569_v38  ;;  %v3636_v30 = vld [vmem:[%s4316_s14 + $0xd4] ss:$8 sps:$4 sm:$0xff]   ;;  %v3634_v0 = vld [vmem:[%s4316_s14 + $0xd0] ss:$8 sps:$4 sm:$0xff]   ;;  %v3645_v36 = vld [vmem:[%s4316_s14 + $0x104] ss:$8 sps:$4 sm:$0xff]  }
 0x695   :  { %2331 = vmatprep.subr.bf16.mxu0 %v3189_v44  ;;  %2372 = vmatprep.subr.bf16.mxu1 %v3191_v45  ;;  %v3247_v44 = vcombine.high %v1566_v39, %v1570_v40  ;;  %v1573_v45 = vld [vmem:[#allocation7 + $0x390] sm:$0xff] }
 0x696   :  { %v3252_v57 = vcombine.low %v1573_v45, %v1577_v46 }
 0x698   :  { %2332 = vmatpush1.bf16.msra.mxu0 %v3188_v50  ;;  %2373 = vmatpush1.bf16.msra.mxu1 %v3190_v51  ;;  %v3246_v50 = vcombine.low %v1566_v39, %v1570_v40  ;;  %v3253_v51 = vcombine.high %v1573_v45, %v1577_v46 }
 0x699   :  { %2333 = vmatprep.subr.bf16.mxu0 %v3197_v52  ;;  %2374 = vmatprep.subr.bf16.mxu1 %v3199_v53  ;;  %v3255_v52 = vcombine.high %v1574_v47, %v1578_v48  ;;  %v1581_v53 = vld [vmem:[#allocation7 + $0x3d0] sm:$0xff] }
 0x69c   :  { %2334 = vmatpush1.bf16.msra.mxu0 %v3196_v58  ;;  %2375 = vmatpush1.bf16.msra.mxu1 %v3198_v59  ;;  %v3254_v58 = vcombine.low %v1574_v47, %v1578_v48  ;;  %v3261_v59 = vcombine.high %v1581_v53, %v1585_v54 }
 0x69d   :  { %2335 = vmatprep.subr.bf16.mxu0 %v3205_v60  ;;  %2376 = vmatprep.subr.bf16.mxu1 %v3207_v62  ;;  %v3263_v60 = vcombine.high %v1582_v55, %v1586_v56  ;;  %v3260_v62 = vcombine.low %v1581_v53, %v1585_v54 }
 0x6a0   :  { %2336 = vmatpush1.bf16.msra.mxu0 %v3204_v5  ;;  %2377 = vmatpush1.bf16.msra.mxu1 %v3206_v6  ;;  %v3598_v5 = vld [vmem:[%s4316_s14 + $0x10] ss:$8 sps:$4 sm:$0xff]   ;;  %v3601_v6 = vld [vmem:[%s4316_s14 + $0x20] ss:$8 sps:$4 sm:$0xff]  }
 0x6a1   :  { %2337 = vmatprep.subr.bf16.mxu0 %v3213_v7  ;;  %2378 = vmatprep.subr.bf16.mxu1 %v3215_v12  ;;  %v3606_v7 = vld [vmem:[%s4316_s14 + $0x34] ss:$8 sps:$4 sm:$0xff]   ;;  %v3604_v12 = vld [vmem:[%s4316_s14 + $0x30] ss:$8 sps:$4 sm:$0xff]  }
 0x6a4   :  { %2338 = vmatpush1.bf16.msra.mxu0 %v3212_v19  ;;  %2379 = vmatpush1.bf16.msra.mxu1 %v3214_v20  ;;  %v3615_v19 = vld [vmem:[%s4316_s14 + $0x64] ss:$8 sps:$4 sm:$0xff]   ;;  %v3613_v20 = vld [vmem:[%s4316_s14 + $0x60] ss:$8 sps:$4 sm:$0xff]  }
 0x6a5   :  { %2339 = vmatprep.subr.bf16.mxu0 %v3221_v21  ;;  %2380 = vmatprep.subr.bf16.mxu1 %v3223_v22  ;;  %v3618_v21 = vld [vmem:[%s4316_s14 + $0x74] ss:$8 sps:$4 sm:$0xff]   ;;  %v3616_v22 = vld [vmem:[%s4316_s14 + $0x70] ss:$8 sps:$4 sm:$0xff]  }
 0x6a8   :  { %2340 = vmatpush1.bf16.msra.mxu0 %v3220_v26  ;;  %2381 = vmatpush1.bf16.msra.mxu1 %v3222_v27  ;;  %v3627_v26 = vld [vmem:[%s4316_s14 + $0xa4] ss:$8 sps:$4 sm:$0xff]   ;;  %v3625_v27 = vld [vmem:[%s4316_s14 + $0xa0] ss:$8 sps:$4 sm:$0xff]  }
 0x6a9   :  { %2341 = vmatprep.subr.bf16.mxu0 %v3229_v10  ;;  %2382 = vmatprep.subr.bf16.mxu1 %v3231_v28  ;;  %v3630_v10 = vld [vmem:[%s4316_s14 + $0xb4] ss:$8 sps:$4 sm:$0xff]   ;;  %v3628_v28 = vld [vmem:[%s4316_s14 + $0xb0] ss:$8 sps:$4 sm:$0xff]  }
 0x6ac   :  { %2342 = vmatpush1.bf16.msra.mxu0 %v3228_v31  ;;  %2383 = vmatpush1.bf16.msra.mxu1 %v3230_v32  ;;  %v3639_v31 = vld [vmem:[%s4316_s14 + $0xe4] ss:$8 sps:$4 sm:$0xff]   ;;  %v3637_v32 = vld [vmem:[%s4316_s14 + $0xe0] ss:$8 sps:$4 sm:$0xff]  }
 0x6ad   :  { %2343 = vmatprep.subr.bf16.mxu0 %v3237_v33  ;;  %2384 = vmatprep.subr.bf16.mxu1 %v3239_v35  ;;  %v3642_v33 = vld [vmem:[%s4316_s14 + $0xf4] ss:$8 sps:$4 sm:$0xff]   ;;  %v3640_v35 = vld [vmem:[%s4316_s14 + $0xf0] ss:$8 sps:$4 sm:$0xff]  }
 0x6b0   :  { %2344 = vmatpush1.bf16.msra.mxu0 %v3236_v41  ;;  %2385 = vmatpush1.bf16.msra.mxu1 %v3238_v42 }
 0x6b1   :  { %2345 = vmatprep.subr.bf16.mxu0 %v3245_v43  ;;  %2386 = vmatprep.subr.bf16.mxu1 %v3247_v44 }
 0x6b4   :  { %2346 = vmatpush1.bf16.msra.mxu0 %v3244_v49  ;;  %2387 = vmatpush1.bf16.msra.mxu1 %v3246_v50 }
 0x6b5   :  { %2347 = vmatprep.subr.bf16.mxu0 %v3253_v51  ;;  %2388 = vmatprep.subr.bf16.mxu1 %v3255_v52 }
 0x6b8   :  { %2348 = vmatpush1.bf16.msra.mxu0 %v3252_v57  ;;  %2389 = vmatpush1.bf16.msra.mxu1 %v3254_v58 }
 0x6b9   :  { %2349 = vmatprep.subr.bf16.mxu0 %v3261_v59  ;;  %2390 = vmatprep.subr.bf16.mxu1 %v3263_v60 }
 0x6bc   :  { %2350 = vmatpush1.bf16.msra.mxu0 %v3260_v62  ;;  %2391 = vmatpush1.bf16.msra.mxu1 %v3262_v63 }
 0x6bd   :  { %2821 = vmatprep.subr.bf16.mxu0 %v3597_v2 }
 0x6bf   :  { %2352 = vmatmul.mubr.bf16.vlgmr.msra.gmra.mrb[12].mxu0 %v4077_v61  ;;  %2393 = vmatmul.mubr.bf16.vlgmr.msra.gmra.mrb[24].mxu1 %v4077_v61  ;;  %v3603_v61 = vld [vmem:[%s4316_s14 + $0x24] ss:$8 sps:$4 sm:$0xff]  }
 0x6c0   :  { %2822 = vmatpush1.bf16.msra.mxu0 %v3595_v3 }
 0x6c1   :  { %2823 = vmatprep.subr.bf16.mxu0 %v3600_v4 }
 0x6c4   :  { %2824 = vmatpush1.bf16.msra.mxu0 %v3598_v5 }
 0x6c5   :  { %2825 = vmatprep.subr.bf16.mxu0 %v3603_v61 }
 0x6c8   :  { %2826 = vmatpush1.bf16.msra.mxu0 %v3601_v6 }
 0x6c9   :  { %2827 = vmatprep.subr.bf16.mxu0 %v3606_v7 }
 0x6cc   :  { %2828 = vmatpush1.bf16.msra.mxu0 %v3604_v12 }
 0x6cd   :  { %2829 = vmatprep.subr.bf16.mxu0 %v3609_v16 }
 0x6d0   :  { %2830 = vmatpush1.bf16.msra.mxu0 %v3607_v17 }
 0x6d1   :  { %2831 = vmatprep.subr.bf16.mxu0 %v3612_v18 }
 0x6d4   :  { %2832 = vmatpush1.bf16.msra.mxu0 %v3610_v9 }
 0x6d5   :  { %2833 = vmatprep.subr.bf16.mxu0 %v3615_v19 }
 0x6d8   :  { %2834 = vmatpush1.bf16.msra.mxu0 %v3613_v20 }
 0x6d9   :  { %2835 = vmatprep.subr.bf16.mxu0 %v3618_v21 }
 0x6dc   :  { %2836 = vmatpush1.bf16.msra.mxu0 %v3616_v22 }
 0x6dd   :  { %2837 = vmatprep.subr.bf16.mxu0 %v3621_v23  ;;  %v3643_v23 = vld [vmem:[%s4316_s14 + $0x100] ss:$8 sps:$4 sm:$0xff]  }
 0x6e0   :  { %2838 = vmatpush1.bf16.msra.mxu0 %v3619_v24 }
 0x6e1   :  { %2839 = vmatprep.subr.bf16.mxu0 %v3624_v25  ;;  %v3648_v25 = vld [vmem:[%s4316_s14 + $0x114] ss:$8 sps:$4 sm:$0xff]  }
 0x6e4   :  { %2840 = vmatpush1.bf16.msra.mxu0 %v3622_v8 }
 0x6e5   :  { %2841 = vmatprep.subr.bf16.mxu0 %v3627_v26  ;;  %v3646_v26 = vld [vmem:[%s4316_s14 + $0x110] ss:$8 sps:$4 sm:$0xff]  }
 0x6e8   :  { %2842 = vmatpush1.bf16.msra.mxu0 %v3625_v27  ;;  %v3651_v27 = vld [vmem:[%s4316_s14 + $0x124] ss:$8 sps:$4 sm:$0xff]  }
 0x6e9   :  { %2843 = vmatprep.subr.bf16.mxu0 %v3630_v10  ;;  %v3649_v10 = vld [vmem:[%s4316_s14 + $0x120] ss:$8 sps:$4 sm:$0xff]  }
 0x6ec   :  { %2844 = vmatpush1.bf16.msra.mxu0 %v3628_v28  ;;  %v3654_v28 = vld [vmem:[%s4316_s14 + $0x134] ss:$8 sps:$4 sm:$0xff]  }
 0x6ed   :  { %2845 = vmatprep.subr.bf16.mxu0 %v3633_v29  ;;  %v3652_v29 = vld [vmem:[%s4316_s14 + $0x130] ss:$8 sps:$4 sm:$0xff]  }
 0x6f0   :  { %2846 = vmatpush1.bf16.msra.mxu0 %v3631_v1  ;;  %v3657_v1 = vld [vmem:[%s4316_s14 + $0x144] ss:$8 sps:$4 sm:$0xff]  }
 0x6f1   :  { %2847 = vmatprep.subr.bf16.mxu0 %v3636_v30  ;;  %v3655_v30 = vld [vmem:[%s4316_s14 + $0x140] ss:$8 sps:$4 sm:$0xff]  }
 0x6f4   :  { %2848 = vmatpush1.bf16.msra.mxu0 %v3634_v0  ;;  %v3660_v0 = vld [vmem:[%s4316_s14 + $0x154] ss:$8 sps:$4 sm:$0xff]  }
 0x6f5   :  { %2849 = vmatprep.subr.bf16.mxu0 %v3639_v31  ;;  %v3658_v31 = vld [vmem:[%s4316_s14 + $0x150] ss:$8 sps:$4 sm:$0xff]  }
 0x6f8   :  { %2850 = vmatpush1.bf16.msra.mxu0 %v3637_v32  ;;  %v3663_v32 = vld [vmem:[%s4316_s14 + $0x164] ss:$8 sps:$4 sm:$0xff]  }
 0x6f9   :  { %2851 = vmatprep.subr.bf16.mxu0 %v3642_v33  ;;  %v3661_v33 = vld [vmem:[%s4316_s14 + $0x160] ss:$8 sps:$4 sm:$0xff]  }
 0x6fc   :  { %2852 = vmatpush1.bf16.msra.mxu0 %v3640_v35  ;;  %v3666_v35 = vld [vmem:[%s4316_s14 + $0x174] ss:$8 sps:$4 sm:$0xff]  }
 0x6fd   :  { %2862 = vmatprep.subr.bf16.mxu0 %v3645_v36  ;;  %v3664_v36 = vld [vmem:[%s4316_s14 + $0x170] ss:$8 sps:$4 sm:$0xff]  }
 0x752   :  { %v2271_v38 = vpop.f32.mrb[8].mxu0  ;;  %v2312_v39 = vpop.f32.mrb[20].mxu1 }
 0x753   :  { %v2273_v40 = vpop.f32.mrb[9].mxu0  ;;  %v2314_v41 = vpop.f32.mrb[21].mxu1  ;;  %v3264_v46 = vmul.f32 -1.442695, %v2271_v38  ;;  %v3266_v47 = vmul.f32 -1.442695, %v2312_v39 }
 0x754   :  { %v2275_v42 = vpop.f32.mrb[10].mxu0  ;;  %v2316_v43 = vpop.f32.mrb[22].mxu1  ;;  %v3265_v48 = vmul.f32 -1.442695, %v2273_v40  ;;  %v3267_v49 = vmul.f32 -1.442695, %v2314_v41 }
 0x755   :  { %v2276_v44 = vpop.f32.mrb[11].mxu0  ;;  %v2317_v45 = vpop.f32.mrb[23].mxu1  ;;  %3699 = vpow2.f32 %v3264_v46  ;;  %v3675_v42 = vld [vmem:[%s4316_s14 + $0x1a4] ss:$8 sps:$4 sm:$0xff]   ;;  %v3673_v43 = vld [vmem:[%s4316_s14 + $0x1a0] ss:$8 sps:$4 sm:$0xff]  }
 0x756   :  { %3701 = vpow2.f32 %v3266_v47  ;;  %v3678_v44 = vld [vmem:[%s4316_s14 + $0x1b4] ss:$8 sps:$4 sm:$0xff]   ;;  %v3676_v45 = vld [vmem:[%s4316_s14 + $0x1b0] ss:$8 sps:$4 sm:$0xff]   ;;  %v3681_v46 = vld [vmem:[%s4316_s14 + $0x1c4] ss:$8 sps:$4 sm:$0xff]  }
 0x757   :  { %3703 = vpow2.f32 %v3265_v48  ;;  %v3679_v47 = vld [vmem:[%s4316_s14 + $0x1c0] ss:$8 sps:$4 sm:$0xff]   ;;  %v3684_v48 = vld [vmem:[%s4316_s14 + $0x1d4] ss:$8 sps:$4 sm:$0xff]  }
 0x758   :  { %3705 = vpow2.f32 %v3267_v49  ;;  %v3682_v49 = vld [vmem:[%s4316_s14 + $0x1d0] ss:$8 sps:$4 sm:$0xff]  }
 0x75f   :  { %v3700_v50 = vpop.eup %3699 }
 0x760   :  { %v3702_v51 = vpop.eup %3701  ;;  %v2413_v54 = vadd.f32 1.0, %v3700_v50  ;;  %v3687_v50 = vld [vmem:[%s4316_s14 + $0x1e4] ss:$8 sps:$4 sm:$0xff]  }
 0x761   :  { %v3704_v52 = vpop.eup %3703  ;;  %v2415_v55 = vadd.f32 1.0, %v3702_v51  ;;  %v3685_v51 = vld [vmem:[%s4316_s14 + $0x1e0] ss:$8 sps:$4 sm:$0xff]  }
 0x762   :  { %v3706_v53 = vpop.eup %3705  ;;  %v2414_v56 = vadd.f32 1.0, %v3704_v52  ;;  %3707 = vrcp.f32 %v2413_v54  ;;  %v3690_v52 = vld [vmem:[%s4316_s14 + $0x1f4] ss:$8 sps:$4 sm:$0xff]  }
 0x763   :  { %v2416_v57 = vadd.f32 1.0, %v3706_v53  ;;  %3709 = vrcp.f32 %v2415_v55  ;;  %v3688_v53 = vld [vmem:[%s4316_s14 + $0x1f0] ss:$8 sps:$4 sm:$0xff]  }
 0x764   :  { %3711 = vrcp.f32 %v2414_v56 }
 0x765   :  { %3713 = vrcp.f32 %v2416_v57 }
 0x76c   :  { %v3708_v58 = vpop.eup %3707 }
 0x76d   :  { %v3710_v59 = vpop.eup %3709  ;;  %v2425_v63 = vmul.f32 %v3708_v58, %v2271_v38  ;;  %v3669_v38 = vld [vmem:[%s4316_s14 + $0x184] ss:$8 sps:$4 sm:$0xff]  }
 0x76e   :  { %v3712_v60 = vpop.eup %3711  ;;  %v2427_v2 = vmul.f32 %v3710_v59, %v2312_v39  ;;  %v3667_v39 = vld [vmem:[%s4316_s14 + $0x180] ss:$8 sps:$4 sm:$0xff]  }
 0x76f   :  { %v3714_v62 = vpop.eup %3713  ;;  %v2426_v3 = vmul.f32 %v3712_v60, %v2273_v40  ;;  %v3672_v40 = vld [vmem:[%s4316_s14 + $0x194] ss:$8 sps:$4 sm:$0xff]  }
 0x770   :  { %v2428_v4 = vmul.f32 %v3714_v62, %v2314_v41  ;;  %v3670_v41 = vld [vmem:[%s4316_s14 + $0x190] ss:$8 sps:$4 sm:$0xff]  }
 0x792   :  { %v2353_v5 = vpop.f32.mrb[12].mxu0  ;;  %v2394_v61 = vpop.f32.mrb[24].mxu1 }
 0x793   :  { %v2429_v6 = vmul.f32 %v2425_v63, %v2353_v5  ;;  %v4182_v7 = vmul.f32 %v2427_v2, %v2394_v61  ;;  %v2355_v12 = vpop.f32.mrb[13].mxu0  ;;  %v2396_v16 = vpop.f32.mrb[25].mxu1 }
 0x794   :  { %v2430_v17 = vmul.f32 %v2426_v3, %v2355_v12  ;;  %v2432_v18 = vmul.f32 %v2428_v4, %v2396_v16  ;;  %v2357_v9 = vpop.f32.mrb[14].mxu0  ;;  %v2398_v19 = vpop.f32.mrb[26].mxu1  ;;  %v3824_v16 = vmov 1966171168  }
 0x795   :  { %v2358_v20 = vpop.f32.mrb[15].mxu0  ;;  %v2399_v21 = vpop.f32.mrb[27].mxu1  ;;  %v2433_v24 = vpack.c.bf16 %v2429_v6, %v2429_v6  ;;  %v2435_v54 = vpack.c.bf16 %v4182_v7, %v4182_v7 }
 0x796   :  { %v2434_v22 = vpack.c.bf16 %v2430_v17, %v2430_v17  ;;  %v2436_v8 = vpack.c.bf16 %v2432_v18, %v2432_v18  ;;  %v2941_v17 = vunpack.c.l.s4 %v3824_v16 }
 0x798   :  { %2853 = vmatprep.mubr.bf16.mxu0 %v2434_v22  ;;  %v2942_v9 = vunpack.c.0.s8 %v2941_v17 }
 0x799   :  { %2854 = vmatmul.mubr.bf16.vlgmr.msra.gmra.mrb[16].mxu0 %v2433_v24 }
 0x79a   :  { %2863 = vmatpush1.bf16.msra.mxu0 %v3643_v23  ;;  %2894 = vmatprep.mubr.bf16.mxu0 %v2436_v8  ;;  %v2945_v24 = vsub.s32 %v2942_v9, %v3972_v13 }
 0x79b   :  { %2864 = vmatprep.subr.bf16.mxu0 %v3648_v25 }
 0x79e   :  { %2865 = vmatpush1.bf16.msra.mxu0 %v3646_v26 }
 0x79f   :  { %2866 = vmatprep.subr.bf16.mxu0 %v3651_v27 }
 0x7a2   :  { %2867 = vmatpush1.bf16.msra.mxu0 %v3649_v10 }
 0x7a3   :  { %2868 = vmatprep.subr.bf16.mxu0 %v3654_v28 }
 0x7a6   :  { %2869 = vmatpush1.bf16.msra.mxu0 %v3652_v29 }
 0x7a7   :  { %2870 = vmatprep.subr.bf16.mxu0 %v3657_v1 }
 0x7aa   :  { %2871 = vmatpush1.bf16.msra.mxu0 %v3655_v30 }
 0x7ab   :  { %2872 = vmatprep.subr.bf16.mxu0 %v3660_v0 }
 0x7ae   :  { %2873 = vmatpush1.bf16.msra.mxu0 %v3658_v31 }
 0x7af   :  { %2874 = vmatprep.subr.bf16.mxu0 %v3663_v32 }
 0x7b2   :  { %2875 = vmatpush1.bf16.msra.mxu0 %v3661_v33 }
 0x7b3   :  { %2876 = vmatprep.subr.bf16.mxu0 %v3666_v35 }
 0x7b6   :  { %2877 = vmatpush1.bf16.msra.mxu0 %v3664_v36 }
 0x7b7   :  { %2878 = vmatprep.subr.bf16.mxu0 %v3669_v38 }
 0x7ba   :  { %2879 = vmatpush1.bf16.msra.mxu0 %v3667_v39 }
 0x7bb   :  { %2880 = vmatprep.subr.bf16.mxu0 %v3672_v40 }
 0x7be   :  { %2881 = vmatpush1.bf16.msra.mxu0 %v3670_v41 }
 0x7bf   :  { %2882 = vmatprep.subr.bf16.mxu0 %v3675_v42 }
 0x7c2   :  { %2883 = vmatpush1.bf16.msra.mxu0 %v3673_v43 }
 0x7c3   :  { %2884 = vmatprep.subr.bf16.mxu0 %v3678_v44 }
 0x7c6   :  { %2885 = vmatpush1.bf16.msra.mxu0 %v3676_v45 }
 0x7c7   :  { %2886 = vmatprep.subr.bf16.mxu0 %v3681_v46 }
 0x7ca   :  { %2887 = vmatpush1.bf16.msra.mxu0 %v3679_v47 }
 0x7cb   :  { %2888 = vmatprep.subr.bf16.mxu0 %v3684_v48 }
 0x7ce   :  { %2889 = vmatpush1.bf16.msra.mxu0 %v3682_v49 }
 0x7cf   :  { %2890 = vmatprep.subr.bf16.mxu0 %v3687_v50 }
 0x7d2   :  { %2891 = vmatpush1.bf16.msra.mxu0 %v3685_v51 }
 0x7d3   :  { %2892 = vmatprep.subr.bf16.mxu0 %v3690_v52 }
 0x7d6   :  { %2893 = vmatpush1.bf16.msra.mxu0 %v3688_v53 }
 0x7d9   :  { %2895 = vmatmul.mubr.bf16.vlgmr.msra.gmra.mrb[16].mxu0 %v2435_v54 }
 0x8ac   :  { %v2896_v55 = vpop.f32.mrb[16].mxu0 }
 0x8ad   :  { %v2905_v56 = vrot.slane %v2896_v55, 1  ;;  %v2898_v57 = vpop.f32.mrb[17].mxu0 }
 0x8ae   :  { %v2906_v58 = vrot.slane %v2898_v57, 1  ;;  %v2900_v59 = vpop.f32.mrb[18].mxu0 }
 0x8af   :  { %v2909_v60 = vadd.f32 %v2905_v56, %v4057_v34  ;;  %v2901_v62 = vpop.f32.mrb[19].mxu0  ;;  %v2911_v34 = vld [vmem:[%s4317_s15] sm:$0x3]  ;;  %s3785_s15 = scalar_lea.vmem %s2973_s13, 32 }
 0x8b0   :  { %v2910_v63 = vadd.f32 %v2906_v58, %v4062_v37  ;;  %v2928_v37 = vrot.slane %v2911_v34, %v3978_v15  ;;  %v2932_v18 = vrot.slane %v2911_v34, %v3975_v14  ;;  %p3786_p10 = scmp.ne.s32.totalorder %s2973_s13, %s3785_s15  ;;  %p3791_p12 = scmp.lt.s32.totalorder %s3785_s15, %s3785_s15 }
 0x8b1   :  { %v2912_v2 = vmul.f32 %v2909_v60, %v2909_v60 }
 0x8b2   :  { %v2913_v3 = vmul.f32 %v2910_v63, %v2910_v63  ;;  %p3792_p13 = por %p3791_p12, %p3790_p11 }
 0x8b3   :  { %v2914_v4 = vsel %vm1433_vm4, %v2912_v2, 0.0 }
 0x8b4   :  { %v2915_v5 = vsel %vm1433_vm4, %v2913_v3, 0.0  ;;  %p3793_p0 = pnand %p3792_p13, %p3786_p10 }
 0x8b5   :  { %v2916_v61 = vadd.f32 %v2915_v5, %v2914_v4 }
 0x8b7   :  { %2917 = vadd.xlane.f32.xlu0 %v2916_v61 }
 0x944   :  { %v2918_v6 = vpop.xlane.xlu0 %2917 }
 0x945   :  { %v2919_v7 = vmul.f32 0.00390625, %v2918_v6 }
 0x947   :  { %v2920_v12 = vadd.f32 1e-05, %v2919_v7 }
 0x949   :  { %3715 = vrsqrt.f32 %v2920_v12 }
 0x953   :  { %v3716_v19 = vpop.eup %3715 }
 0x954   :  { %v2922_v20 = vmul.f32 %v3716_v19, %v2909_v60  ;;  %v2923_v21 = vmul.f32 %v3716_v19, %v2910_v63 }
 0x956   :  { %v2935_v22 = vmul.f32 %v2928_v37, %v2922_v20  ;;  %v2936_v23 = vmul.f32 %v2932_v18, %v2923_v21 }
 0x958   :  { %v2939_v25 = vcombine.high %v2935_v22, %v2936_v23 }
 0x95a   :  { %v2946_v8 = vrot.slane %v2939_v25, %v2945_v24 }
 0x95c   :  { %v2947_v26 = vcombine.high %v2946_v8, %v2946_v8 }
 0x95e   :  { %v2954_v27 = vrot.slane %v2947_v26, %v2945_v24 }
 0x960   :  { %v2955_v10 = vcombine.high %v2954_v27, %v2954_v27 }
 0x962   :  { %2961 = vst.msk [vmem:[#allocation8] sm:$0x3] %vm2959_vm5, %v2955_v10 }
 0x963   :  { %3796 = shalt.err (!%p3793_p0)
}
 0x964   :  { %s3797_s11 = scalar_lea.hbm %s4318_s16, 32 }
 0x965   :  { %p3798_p1 = scmp.ne.s32.totalorder %s4318_s16, %s3797_s11  ;;  %p3801_p2 = scmp.lt.u32.totalorder %s3797_s11, %s4318_s16 }
 0x967   :  { %p3803_p3 = pnand %p3801_p2, %p3798_p1 }
 0x969   :  { %3806 = shalt.err (!%p3803_p3)
}
 0x96a   :  { %2975 = dma.vmem_to_hbm [thread:$0]  %s2973_s13, 32, %s4318_s16, [#allocation4]  }
 0x96b   :  { %3811 = dma.done.wait [#allocation4], 32  }
 0x96c   :  { %3812 = vsyncadd [#allocation4], 4294967264 }
 0x96d   :  { %2987 = vsyncpa [#allocation3], 1 }
 0x96e   :  { %2988 = vsyncpa [#allocation6], 1 }
 0x96f   :  { %2989 = vsyncpa [#allocation4], 1 }

</bundles_post_ra>
